<compile_context>
chip_gen: v7x
topology: tpu7x:2x2x1
jax: 0.10.0
libtpu: 0.0.40
codegen_flags: <defaults>
</compile_context>

<pallas_src>
import jax
import jax.numpy as jnp
from jax.experimental import pallas as pl
from jax.experimental.pallas import tpu as pltpu

_BN_EPS = 1e-5
_L2_EPS = 1e-12  # only guards degenerate all-zero rows (torch.div would give inf/nan)


def _projection_head_kernel(x_ref, w1_ref, g1_ref, b1_ref,
                            w2_ref, g2_ref, b2_ref, o_ref,
                            xn_ref, zacc_ref):
    k = pl.program_id(1)           # HID-tile index (reduction axis, "arbitrary")
    nk = pl.num_programs(1)
    inv_b = 1.0 / x_ref.shape[0]   # static batch size

    # --- init at the start of each output tile's K loop.  Guarded only on the
    #     arbitrary axis so it stays correct under megacore sharding of axis 0. ---
    @pl.when(k == 0)
    def _():
        x = x_ref[...].astype(jnp.float32)
        sumsq = jnp.sum(x * x, axis=1, keepdims=True)
        inv_norm = jax.lax.rsqrt(jnp.maximum(sumsq, _L2_EPS * _L2_EPS))
        xn_ref[...] = (x * inv_norm).astype(xn_ref.dtype)     # bf16 for the MXU
        zacc_ref[...] = jnp.zeros_like(zacc_ref)

    # --- Linear(in -> hidden), this HID tile: bf16 MXU, f32 accumulation ---
    h = jnp.dot(xn_ref[...], w1_ref[...], preferred_element_type=jnp.float32)

    # --- BatchNorm1d(hidden) on this feature tile, training-mode stats.
    #     One pass: sum & sum-of-squares; var = E[h^2] - E[h]^2 (biased, clamped).
    #     Affine folded into a single per-feature scale/shift. ---
    s1 = jnp.sum(h, axis=0, keepdims=True)
    s2 = jnp.sum(h * h, axis=0, keepdims=True)
    mu = s1 * inv_b
    var = jnp.maximum(s2 * inv_b - mu * mu, 0.0)
    scale1 = g1_ref[...] * jax.lax.rsqrt(var + _BN_EPS)
    shift1 = b1_ref[...] - mu * scale1
    h = h * scale1 + shift1

    # --- ReLU ---
    h = jnp.maximum(h, 0.0)

    # --- Linear(hidden -> out), accumulated over HID tiles (f32 accumulator) ---
    zacc_ref[...] += jnp.dot(h.astype(w2_ref.dtype), w2_ref[...],
                             preferred_element_type=jnp.float32)

    # --- finalize on the last HID tile: BatchNorm1d(out) + lane-dense store ---
    @pl.when(k == nk - 1)
    def _():
        z = zacc_ref[...]
        t1 = jnp.sum(z, axis=0, keepdims=True)
        t2 = jnp.sum(z * z, axis=0, keepdims=True)
        mu2 = t1 * inv_b
        var2 = jnp.maximum(t2 * inv_b - mu2 * mu2, 0.0)
        scale2 = g2_ref[...] * jax.lax.rsqrt(var2 + _BN_EPS)
        shift2 = b2_ref[...] - mu2 * scale2
        o_ref[...] = (z * scale2 + shift2).astype(o_ref.dtype)


def projection_head(x, w1_t, gamma1, beta1, w2_t, gamma2, beta2,
                    *, tile_hid=256, tile_out=128):
    """x: (B, in); w1_t: (in, hidden); w2_t: (hidden, out) (pre-transposed
    PyTorch Linear weights); gamma/beta: (1, hidden) and (1, out)."""
    B, IN = x.shape
    IN2, HID = w1_t.shape
    HID2, OUT = w2_t.shape
    assert IN == IN2 and HID == HID2
    tile_hid = min(tile_hid, HID)
    tile_out = min(tile_out, OUT)
    assert HID % tile_hid == 0, "hidden dim must be a multiple of tile_hid"
    assert OUT % tile_out == 0, "out dim must be a multiple of tile_out"

    # bf16 weights: native MXU rate + half the weight HBM->VMEM traffic.
    w1_bf = w1_t.astype(jnp.bfloat16)
    w2_bf = w2_t.astype(jnp.bfloat16)

    n_j = OUT // tile_out    # output-feature tiles (parallel)
    n_k = HID // tile_hid    # hidden-feature tiles (reduction for 2nd matmul)

    flops = 2 * B * (IN * HID + HID * OUT) + 12 * B * (HID + OUT)
    transcendentals = B + HID + OUT            # rsqrt per row + per BN feature
    bytes_accessed = (x.size * 4 + w1_bf.size * 2 + w2_bf.size * 2
                      + (gamma1.size + beta1.size + gamma2.size + beta2.size) * 4
                      + B * OUT * 4)

    grid_spec = pltpu.PrefetchScalarGridSpec(
        num_scalar_prefetch=0,
        grid=(n_j, n_k),
        in_specs=[
            pl.BlockSpec((B, IN), lambda j, k: (0, 0)),                # x (resident)
            pl.BlockSpec((IN, tile_hid), lambda j, k: (0, k)),         # W1 column tile
            pl.BlockSpec((1, tile_hid), lambda j, k: (0, k)),          # gamma1 tile
            pl.BlockSpec((1, tile_hid), lambda j, k: (0, k)),          # beta1 tile
            pl.BlockSpec((tile_hid, tile_out), lambda j, k: (k, j)),   # W2 tile
            pl.BlockSpec((1, tile_out), lambda j, k: (0, j)),          # gamma2 tile
            pl.BlockSpec((1, tile_out), lambda j, k: (0, j)),          # beta2 tile
        ],
        out_specs=pl.BlockSpec((B, tile_out), lambda j, k: (0, j)),
        scratch_shapes=[
            pltpu.VMEM((B, IN), jnp.bfloat16),       # cached l2-normalized x
            pltpu.VMEM((B, tile_out), jnp.float32),  # z accumulator
        ],
    )

    return pl.pallas_call(
        _projection_head_kernel,
        out_shape=jax.ShapeDtypeStruct((B, OUT), jnp.float32),
        grid_spec=grid_spec,
        compiler_params=pltpu.CompilerParams(
            dimension_semantics=("parallel", "arbitrary"),
            vmem_limit_bytes=32 * 1024 * 1024,
        ),
        cost_estimate=pl.CostEstimate(
            flops=flops,
            transcendentals=transcendentals,
            bytes_accessed=bytes_accessed),
    )(x, w1_bf, gamma1, beta1, w2_bf, gamma2, beta2)


def _reference(x, w1_t, gamma1, beta1, w2_t, gamma2, beta2,
               matmul_dtype=jnp.float32):
    """Pure-JAX reference. matmul_dtype=bf16 mirrors the kernel's numerics."""
    xn = x / jnp.maximum(jnp.linalg.norm(x, axis=1, keepdims=True), _L2_EPS)
    h = jnp.dot(xn.astype(matmul_dtype), w1_t.astype(matmul_dtype),
                preferred_element_type=jnp.float32)
    mu, var = jnp.mean(h, 0, keepdims=True), jnp.var(h, 0, keepdims=True)
    h = (h - mu) / jnp.sqrt(var + _BN_EPS) * gamma1 + beta1
    h = jnp.maximum(h, 0.0)
    z = jnp.dot(h.astype(matmul_dtype), w2_t.astype(matmul_dtype),
                preferred_element_type=jnp.float32)
    mu, var = jnp.mean(z, 0, keepdims=True), jnp.var(z, 0, keepdims=True)
    return (z - mu) / jnp.sqrt(var + _BN_EPS) * gamma2 + beta2


if __name__ == "__main__":
    # Small but MXU/vreg-aligned shapes: batch multiple of 8 (sublanes), feature
    # dims multiples of 128 (lane-dense stores, no masked vst).
    B, IN, HID, OUT = 128, 256, 512, 128

    key = jax.random.PRNGKey(0)
    kx, kw1, kw2, kg1, kb1, kg2, kb2 = jax.random.split(key, 7)

    x = jax.random.normal(kx, (B, IN), dtype=jnp.float32)
    # PyTorch Linear weight is (out, in); stored transposed here as (in, out).
    w1_t = 0.05 * jax.random.normal(kw1, (IN, HID), dtype=jnp.float32)
    w2_t = 0.05 * jax.random.normal(kw2, (HID, OUT), dtype=jnp.float32)
    gamma1 = 1.0 + 0.1 * jax.random.normal(kg1, (1, HID), dtype=jnp.float32)
    beta1 = 0.1 * jax.random.normal(kb1, (1, HID), dtype=jnp.float32)
    gamma2 = 1.0 + 0.1 * jax.random.normal(kg2, (1, OUT), dtype=jnp.float32)
    beta2 = 0.1 * jax.random.normal(kb2, (1, OUT), dtype=jnp.float32)

    out = projection_head(x, w1_t, gamma1, beta1, w2_t, gamma2, beta2)
    out = jax.block_until_ready(out)
    assert out.shape == (B, OUT)
    assert bool(jnp.all(jnp.isfinite(out)))

    # Strict check vs a reference using the same bf16-matmul / f32-accum numerics.
    ref_bf16 = _reference(x, w1_t, gamma1, beta1, w2_t, gamma2, beta2,
                          matmul_dtype=jnp.bfloat16)
    assert jnp.allclose(out, ref_bf16, atol=5e-3, rtol=5e-3), "mismatch vs bf16 reference"

    # Loose semantic check vs the pure-f32 PyTorch-equivalent math (bf16 matmul
    # quantization is the only difference).
    ref_f32 = _reference(x, w1_t, gamma1, beta1, w2_t, gamma2, beta2,
                         matmul_dtype=jnp.float32)
    assert jnp.allclose(out, ref_f32, atol=5e-2, rtol=5e-2), "mismatch vs f32 reference"

    # TODO(synk): BatchNorm running-stat (momentum buffer) updates are a training
    # side-effect and are not materialized by this forward-only kernel.
    print("KERNEL_OK")
</pallas_src>

<mosaic_0001>
module attributes {stable_mosaic.version = 11 : i64} {
  func.func @_projection_head_kernel(%arg0: i32, %arg1: i32, %arg2: memref<128x256xf32, #tpu.memory_space<vmem>>, %arg3: memref<256x256xbf16, #tpu.memory_space<vmem>>, %arg4: memref<1x256xf32, #tpu.memory_space<vmem>>, %arg5: memref<1x256xf32, #tpu.memory_space<vmem>>, %arg6: memref<256x128xbf16, #tpu.memory_space<vmem>>, %arg7: memref<1x128xf32, #tpu.memory_space<vmem>>, %arg8: memref<1x128xf32, #tpu.memory_space<vmem>>, %arg9: memref<128x128xf32, #tpu.memory_space<vmem>>, %arg10: memref<128x256xbf16, #tpu.memory_space<vmem>>, %arg11: memref<128x128xf32, #tpu.memory_space<vmem>>) attributes {dimension_semantics = [#tpu.dimension_semantics<parallel>, #tpu.dimension_semantics<arbitrary>], iteration_bounds = array<i64: 1, 2>, scalar_prefetch = 0 : i64, scratch_operands = 2 : i64, tpu.core_type = #tpu.core_type<tc>, window_params = [{pipeline_mode = #tpu.pipeline_mode<synchronous>, transform_indices = @transform_0, window_bounds = array<i64: 128, 256>}, {transform_indices = @transform_1, window_bounds = array<i64: 256, 256>}, {transform_indices = @transform_2, window_bounds = array<i64: 1, 256>}, {transform_indices = @transform_3, window_bounds = array<i64: 1, 256>}, {transform_indices = @transform_4, window_bounds = array<i64: 256, 128>}, {transform_indices = @transform_5, window_bounds = array<i64: 1, 128>}, {transform_indices = @transform_6, window_bounds = array<i64: 1, 128>}, {transform_indices = @transform_7, window_bounds = array<i64: 128, 128>}]} {
    %c0_i32 = arith.constant 0 : i32
    %0 = arith.cmpi eq, %arg1, %c0_i32 : i32
    %1 = arith.extui %0 : i1 to i32
    %c0_i32_0 = arith.constant 0 : i32
    %2 = arith.cmpi ne, %1, %c0_i32_0 : i32
    scf.if %2 {
      %c0_23 = arith.constant 0 : index
      %c0_24 = arith.constant 0 : index
      %42 = vector.load %arg2[%c0_23, %c0_24] : memref<128x256xf32, #tpu.memory_space<vmem>>, vector<128x256xf32>
      %43 = arith.mulf %42, %42 : vector<128x256xf32>
      %cst_25 = arith.constant dense<0.000000e+00> : vector<128xf32>
      %44 = vector.multi_reduction <add>, %43, %cst_25 [1] : vector<128x256xf32> to vector<128xf32>
      %45 = vector.shape_cast %44 : vector<128xf32> to vector<128x1xf32>
      %cst_26 = arith.constant 1.000000e-24 : f32
      %46 = vector.broadcast %cst_26 : f32 to vector<128x1xf32>
      %47 = arith.maximumf %45, %46 : vector<128x1xf32>
      %48 = math.rsqrt %47 : vector<128x1xf32>
      %49 = vector.broadcast %48 : vector<128x1xf32> to vector<128x256xf32>
      %50 = arith.mulf %42, %49 : vector<128x256xf32>
      %51 = arith.truncf %50 : vector<128x256xf32> to vector<128x256xbf16>
      %c0_27 = arith.constant 0 : index
      %c0_28 = arith.constant 0 : index
      %52 = vector.load %arg10[%c0_27, %c0_28] : memref<128x256xbf16, #tpu.memory_space<vmem>>, vector<128x256xbf16>
      tpu.vector_store %arg10[%c0_27, %c0_28], %51 {strides = array<i32>} : memref<128x256xbf16, #tpu.memory_space<vmem>>, vector<128x256xbf16>,
      %cst_29 = arith.constant 0.000000e+00 : f32
      %53 = vector.broadcast %cst_29 : f32 to vector<128x128xf32>
      %c0_30 = arith.constant 0 : index
      %c0_31 = arith.constant 0 : index
      %54 = vector.load %arg11[%c0_30, %c0_31] : memref<128x128xf32, #tpu.memory_space<vmem>>, vector<128x128xf32>
      tpu.vector_store %arg11[%c0_30, %c0_31], %53 {strides = array<i32>} : memref<128x128xf32, #tpu.memory_space<vmem>>, vector<128x128xf32>,
    } else {
    }
    %c0 = arith.constant 0 : index
    %c0_1 = arith.constant 0 : index
    %3 = vector.load %arg10[%c0, %c0_1] : memref<128x256xbf16, #tpu.memory_space<vmem>>, vector<128x256xbf16>
    %c0_2 = arith.constant 0 : index
    %c0_3 = arith.constant 0 : index
    %4 = vector.load %arg3[%c0_2, %c0_3] : memref<256x256xbf16, #tpu.memory_space<vmem>>, vector<256x256xbf16>
    %cst = arith.constant dense<0.000000e+00> : vector<128x256xf32>
    %5 = tpu.matmul %3, %4, %cst {dimension_numbers = #tpu.dot_dimension_numbers<[1], [0], [0], [1], [0, 0, 1, 1], [], []>} : vector<128x256xbf16>, vector<256x256xbf16>, vector<128x256xf32> -> vector<128x256xf32>
    %cst_4 = arith.constant dense<0.000000e+00> : vector<256xf32>
    %6 = vector.multi_reduction <add>, %5, %cst_4 [0] : vector<128x256xf32> to vector<256xf32>
    %7 = vector.shape_cast %6 : vector<256xf32> to vector<1x256xf32>
    %8 = arith.mulf %5, %5 : vector<128x256xf32>
    %cst_5 = arith.constant dense<0.000000e+00> : vector<256xf32>
    %9 = vector.multi_reduction <add>, %8, %cst_5 [0] : vector<128x256xf32> to vector<256xf32>
    %10 = vector.shape_cast %9 : vector<256xf32> to vector<1x256xf32>
    %cst_6 = arith.constant 7.812500e-03 : f32
    %11 = vector.broadcast %cst_6 : f32 to vector<1x256xf32>
    %12 = arith.mulf %7, %11 : vector<1x256xf32>
    %cst_7 = arith.constant 7.812500e-03 : f32
    %13 = vector.broadcast %cst_7 : f32 to vector<1x256xf32>
    %14 = arith.mulf %10, %13 : vector<1x256xf32>
    %15 = arith.mulf %12, %12 : vector<1x256xf32>
    %16 = arith.subf %14, %15 : vector<1x256xf32>
    %cst_8 = arith.constant 0.000000e+00 : f32
    %17 = vector.broadcast %cst_8 : f32 to vector<1x256xf32>
    %18 = arith.maximumf %16, %17 : vector<1x256xf32>
    %c0_9 = arith.constant 0 : index
    %c0_10 = arith.constant 0 : index
    %19 = vector.load %arg4[%c0_9, %c0_10] : memref<1x256xf32, #tpu.memory_space<vmem>>, vector<1x256xf32>
    %cst_11 = arith.constant 9.99999974E-6 : f32
    %20 = vector.broadcast %cst_11 : f32 to vector<1x256xf32>
    %21 = arith.addf %18, %20 : vector<1x256xf32>
    %22 = math.rsqrt %21 : vector<1x256xf32>
    %23 = arith.mulf %19, %22 : vector<1x256xf32>
    %c0_12 = arith.constant 0 : index
    %c0_13 = arith.constant 0 : index
    %24 = vector.load %arg5[%c0_12, %c0_13] : memref<1x256xf32, #tpu.memory_space<vmem>>, vector<1x256xf32>
    %25 = arith.mulf %12, %23 : vector<1x256xf32>
    %26 = arith.subf %24, %25 : vector<1x256xf32>
    %27 = vector.broadcast %23 : vector<1x256xf32> to vector<128x256xf32>
    %28 = arith.mulf %5, %27 : vector<128x256xf32>
    %29 = vector.broadcast %26 : vector<1x256xf32> to vector<128x256xf32>
    %30 = arith.addf %28, %29 : vector<128x256xf32>
    %cst_14 = arith.constant 0.000000e+00 : f32
    %31 = vector.broadcast %cst_14 : f32 to vector<128x256xf32>
    %32 = arith.maximumf %30, %31 : vector<128x256xf32>
    %c0_15 = arith.constant 0 : index
    %c0_16 = arith.constant 0 : index
    %33 = vector.load %arg11[%c0_15, %c0_16] : memref<128x128xf32, #tpu.memory_space<vmem>>, vector<128x128xf32>
    %34 = arith.truncf %32 : vector<128x256xf32> to vector<128x256xbf16>
    %c0_17 = arith.constant 0 : index
    %c0_18 = arith.constant 0 : index
    %35 = vector.load %arg6[%c0_17, %c0_18] : memref<256x128xbf16, #tpu.memory_space<vmem>>, vector<256x128xbf16>
    %cst_19 = arith.constant dense<0.000000e+00> : vector<128x128xf32>
    %36 = tpu.matmul %34, %35, %cst_19 {dimension_numbers = #tpu.dot_dimension_numbers<[1], [0], [0], [1], [0, 0, 1, 1], [], []>} : vector<128x256xbf16>, vector<256x128xbf16>, vector<128x128xf32> -> vector<128x128xf32>
    %37 = arith.addf %33, %36 : vector<128x128xf32>
    %c0_20 = arith.constant 0 : index
    %c0_21 = arith.constant 0 : index
    %38 = vector.load %arg11[%c0_20, %c0_21] : memref<128x128xf32, #tpu.memory_space<vmem>>, vector<128x128xf32>
    tpu.vector_store %arg11[%c0_20, %c0_21], %37 {strides = array<i32>} : memref<128x128xf32, #tpu.memory_space<vmem>>, vector<128x128xf32>,
    %c1_i32 = arith.constant 1 : i32
    %39 = arith.cmpi eq, %arg1, %c1_i32 : i32
    %40 = arith.extui %39 : i1 to i32
    %c0_i32_22 = arith.constant 0 : i32
    %41 = arith.cmpi ne, %40, %c0_i32_22 : i32
    scf.if %41 {
      %c0_23 = arith.constant 0 : index
      %c0_24 = arith.constant 0 : index
      %42 = vector.load %arg11[%c0_23, %c0_24] : memref<128x128xf32, #tpu.memory_space<vmem>>, vector<128x128xf32>
      %cst_25 = arith.constant dense<0.000000e+00> : vector<128xf32>
      %43 = vector.multi_reduction <add>, %42, %cst_25 [0] : vector<128x128xf32> to vector<128xf32>
      %44 = vector.shape_cast %43 : vector<128xf32> to vector<1x128xf32>
      %45 = arith.mulf %42, %42 : vector<128x128xf32>
      %cst_26 = arith.constant dense<0.000000e+00> : vector<128xf32>
      %46 = vector.multi_reduction <add>, %45, %cst_26 [0] : vector<128x128xf32> to vector<128xf32>
      %47 = vector.shape_cast %46 : vector<128xf32> to vector<1x128xf32>
      %cst_27 = arith.constant 7.812500e-03 : f32
      %48 = vector.broadcast %cst_27 : f32 to vector<1x128xf32>
      %49 = arith.mulf %44, %48 : vector<1x128xf32>
      %cst_28 = arith.constant 7.812500e-03 : f32
      %50 = vector.broadcast %cst_28 : f32 to vector<1x128xf32>
      %51 = arith.mulf %47, %50 : vector<1x128xf32>
      %52 = arith.mulf %49, %49 : vector<1x128xf32>
      %53 = arith.subf %51, %52 : vector<1x128xf32>
      %cst_29 = arith.constant 0.000000e+00 : f32
      %54 = vector.broadcast %cst_29 : f32 to vector<1x128xf32>
      %55 = arith.maximumf %53, %54 : vector<1x128xf32>
      %c0_30 = arith.constant 0 : index
      %c0_31 = arith.constant 0 : index
      %56 = vector.load %arg7[%c0_30, %c0_31] : memref<1x128xf32, #tpu.memory_space<vmem>>, vector<1x128xf32>
      %cst_32 = arith.constant 9.99999974E-6 : f32
      %57 = vector.broadcast %cst_32 : f32 to vector<1x128xf32>
      %58 = arith.addf %55, %57 : vector<1x128xf32>
      %59 = math.rsqrt %58 : vector<1x128xf32>
      %60 = arith.mulf %56, %59 : vector<1x128xf32>
      %c0_33 = arith.constant 0 : index
      %c0_34 = arith.constant 0 : index
      %61 = vector.load %arg8[%c0_33, %c0_34] : memref<1x128xf32, #tpu.memory_space<vmem>>, vector<1x128xf32>
      %62 = arith.mulf %49, %60 : vector<1x128xf32>
      %63 = arith.subf %61, %62 : vector<1x128xf32>
      %64 = vector.broadcast %60 : vector<1x128xf32> to vector<128x128xf32>
      %65 = arith.mulf %42, %64 : vector<128x128xf32>
      %66 = vector.broadcast %63 : vector<1x128xf32> to vector<128x128xf32>
      %67 = arith.addf %65, %66 : vector<128x128xf32>
      %c0_35 = arith.constant 0 : index
      %c0_36 = arith.constant 0 : index
      %68 = vector.load %arg9[%c0_35, %c0_36] : memref<128x128xf32, #tpu.memory_space<vmem>>, vector<128x128xf32>
      tpu.vector_store %arg9[%c0_35, %c0_36], %67 {strides = array<i32>} : memref<128x128xf32, #tpu.memory_space<vmem>>, vector<128x128xf32>,
    } else {
    }
    return
  }
  func.func @transform_0(%arg0: i32, %arg1: i32) -> (i32, i32) {
    %c0_i32 = arith.constant 0 : i32
    %c0_i32_0 = arith.constant 0 : i32
    %c0_i32_1 = arith.constant 0 : i32
    return %c0_i32, %c0_i32_0 : i32, i32
  }
  func.func @transform_1(%arg0: i32, %arg1: i32) -> (i32, i32) {
    %c0_i32 = arith.constant 0 : i32
    %c0_i32_0 = arith.constant 0 : i32
    return %c0_i32, %arg1 : i32, i32
  }
  func.func @transform_2(%arg0: i32, %arg1: i32) -> (i32, i32) {
    %c0_i32 = arith.constant 0 : i32
    %c0_i32_0 = arith.constant 0 : i32
    return %c0_i32, %arg1 : i32, i32
  }
  func.func @transform_3(%arg0: i32, %arg1: i32) -> (i32, i32) {
    %c0_i32 = arith.constant 0 : i32
    %c0_i32_0 = arith.constant 0 : i32
    return %c0_i32, %arg1 : i32, i32
  }
  func.func @transform_4(%arg0: i32, %arg1: i32) -> (i32, i32) {
    %c0_i32 = arith.constant 0 : i32
    return %arg1, %arg0 : i32, i32
  }
  func.func @transform_5(%arg0: i32, %arg1: i32) -> (i32, i32) {
    %c0_i32 = arith.constant 0 : i32
    %c0_i32_0 = arith.constant 0 : i32
    return %c0_i32, %arg0 : i32, i32
  }
  func.func @transform_6(%arg0: i32, %arg1: i32) -> (i32, i32) {
    %c0_i32 = arith.constant 0 : i32
    %c0_i32_0 = arith.constant 0 : i32
    return %c0_i32, %arg0 : i32, i32
  }
  func.func @transform_7(%arg0: i32, %arg1: i32) -> (i32, i32) {
    %c0_i32 = arith.constant 0 : i32
    %c0_i32_0 = arith.constant 0 : i32
    return %c0_i32, %arg0 : i32, i32
  }
}

</mosaic_0001>

<bundles_post_ra>
// kernel: tpu_custom_call.1
= control target key start
LH: loop header
LB: loop body
LE: loop exit
PB: predicated region body
PF: predicated region fallthrough
CT: control target
= control target key end

     0   :  { %s3231_s0 = inlined_call_operand.hbm [shape: f32[128,256], index: 0, kind: input, shape index: {}]   ;;  %s3232_s1 = inlined_call_operand.hbm [shape: bf16[256,512], index: 1, kind: input, shape index: {}]   ;;  %s3233_s2 = inlined_call_operand.vmem [shape: f32[1,512], index: 2, kind: input, shape index: {}]   ;;  %s3234_s3 = inlined_call_operand.vmem [shape: f32[1,512], index: 3, kind: input, shape index: {}]   ;;  %s3235_s4 = inlined_call_operand.hbm [shape: bf16[512,128], index: 4, kind: input, shape index: {}]   ;;  %s3236_s5 = inlined_call_operand.vmem [shape: f32[1,128], index: 5, kind: input, shape index: {}]   ;;  %s3237_s6 = inlined_call_operand.vmem [shape: f32[1,128], index: 6, kind: input, shape index: {}]   ;;  %s3238_s7 = inlined_call_operand.hbm [shape: f32[128,128], index: 7, kind: output, shape index: {}]  }
   0x1   :  { %3248 = sst [smem:[#allocation16_spill]] %s3232_s1 }
   0x2   :  { %12 = vsyncpa [#allocation5], 0 }
   0x3   :  { %13 = vsyncpa [#allocation8], 0 }
   0x4   :  { %15 = vsyncpa [#allocation8 + $0x1], 0 }
   0x5   :  { %16 = vsyncpa [#allocation6], 0  ;;  %s2408_s24 = smov 0   ;;  %s2410_s25 = smov 0  }
   0x6   :  { %s2412_s26 = smov 0   ;;  %s2414_s27 = smov 0  }
   0x7   :  { %s2416_s28 = smov 0   ;;  %s2418_s29 = smov 0  }
   0x8 LB: > { %3249 = sst [smem:[#allocation14_spill]] %s2348_s28  ;;  %s31_s30 = sadd.s32 1, %s2348_s28  ;;  %s2352_s29 = sphi %s2418_s29, %s22_s29   ;;  %s2348_s28 = sphi %s2416_s28, %s3265_s28   ;;  %s2344_s27 = sphi %s2414_s27, %s3264_s27   ;;  %s2340_s26 = sphi %s2412_s26, %s3268_s26   ;;  %s2336_s25 = sphi %s2410_s25, %s3267_s25   ;;  %s2332_s24 = sphi %s2408_s24, %s3266_s24  }
   0x9   : > { %s62_s8 = sadd.s32 1, %s2340_s26  ;;  %p32_p0 = scmp.ge.s32.totalorder %s31_s30, 2 }
   0xa   : > { %p69_p1 = scmp.ne.s32.totalorder %s2340_s26, %s2336_s25  ;;  %p70_p2 = scmp.eq.s32.totalorder %s2352_s29, 0 }
   0xb   : > { %s3270_s30 = smov (%p32_p0, %s31_s30), 0  ;;  %p2014_p4 = scmp.lt.s32.totalorder %s2352_s29, 2 }
   0xc   : > { %3250 = sst [smem:[#allocation15_spill]] %s3270_s30  ;;  %p71_p3 = por %p70_p2, %p69_p1 }
   0xd   : > { %s59_s9 = ssub.s32 %s2348_s28, %s3270_s30  ;;  %s282_s10 = sand.u32 1, %s2352_s29  }
   0xe   : > { %p60_p5 = scmp.eq.s32.totalorder %s59_s9, 0  ;;  %s284_s11 = sand.u32 1, %s2340_s26  }
   0xf   : > { %s1858_s13 = sshll.u32 %s284_s11, 8  ;;  %s1924_s14 = sshll.u32 %s2348_s28, 7 }
  0x10   : > { %s2451_s12 = scalar_select %p60_p5, %s2340_s26, %s62_s8  }
  0x11   : > { %s3251_s1 = sld [smem:[#allocation16_spill]]  ;;  %s286_s18 = scalar_lea.vmem [#allocation7], %s1858_s13 }
  0x12   : > { %s293_s19 = sshll.u32 %s286_s18, 4  ;;  %p2461_p6 = pnand %p2014_p4, %p71_p3  ;;  %s2465_s19 = int_to_ptr.vmem [resolvable:$true] %s293_s19 }
  0x13   : > { %s2467_s21 = scalar_lea.sflag [#allocation8], %s282_s10 }
  0x14   : > { %s3252_s20 = scalar_select %p2461_p6, 1, 0 }
  0x15   : > { %p3243_p8 = pneg %p2461_p6 }
  0x17   : > { %s2459_s17 = scalar_lea.hbm %s3251_s1, %s1924_s14  ;;  %s2185_s9 = scalar_lea.hbm %s3251_s1, 8192 }
  0x18   : > { %s2180_s22 = scalar_lea.hbm %s2459_s17, 4096  ;;  %p2186_p11 = scmp.lt.u32.totalorder %s2459_s17, %s3251_s1 }
  0x19   : > { %p2181_p7 = scmp.ne.s32.totalorder %s2459_s17, %s2180_s22  ;;  %p2187_p12 = scmp.lt.u32.totalorder %s2185_s9, %s2180_s22 }
  0x1a   : > { %p2189_p0 = scmp.lt.u32.totalorder %s2180_s22, %s2459_s17 }
  0x1b   : > { %p2183_p9 = pnand %p3243_p8, %p2181_p7  ;;  %p2188_p13 = por %p2187_p12, %p2186_p11 }
  0x1d   : > { %p2184_p10 = pneg %p2183_p9  ;;  %p2190_p1 = por %p2189_p0, %p2188_p13 }
  0x1f   : > { %p2191_p2 = pnand %p2190_p1, %p2184_p10 }
  0x21   : > { %2194 = shalt.err (!%p2191_p2)
}
  0x22   : > { %s2195_s10 = scalar_lea.vmem %s2465_s19, 4096  ;;  %s2354_s15 = smov [#allocation7]  }
  0x23   : > { %p2196_p3 = scmp.ne.s32.totalorder %s2465_s19, %s2195_s10  ;;  %s2200_s16 = sshll.u32 %s2354_s15, 4  ;;  %s2201_s16 = int_to_ptr.vmem [resolvable:$false] %s2200_s16 }
  0x24   : > { %s2202_s18 = scalar_lea.vmem %s2201_s16, 8192  ;;  %p2203_p7 = scmp.lt.s32.totalorder %s2465_s19, %s2201_s16 }
  0x25   : > { %p2198_p4 = pnand %p2196_p3, %p3243_p8  ;;  %p2204_p9 = scmp.lt.s32.totalorder %s2202_s18, %s2195_s10 }
  0x27   : > { %p2199_p5 = pneg %p2198_p4  ;;  %p2205_p11 = por %p2204_p9, %p2203_p7 }
  0x29   : > { %p2206_p12 = pnand %p2205_p11, %p2199_p5 }
  0x2b   : > { %2209 = shalt.err (!%p2206_p12)
}
  0x2c   : > { %s3239_s22 = smov 256   ;;  %s2356_s23 = smov 128  }
  0x2d   : > { %s2357_s8 = smov 8   ;;  %s2497_s9 = sadd.s32 4294967295, %s2352_s29  }
  0x2e   : > { %2009 = dma.hbm_to_vmem [thread:$0]  (!%p2461_p6), %s2459_s17, 4096, %s2465_s19, %s2467_s21, %s3239_s22, %s2356_s23, %s2357_s8  }
  0x2f   : > { %p75_p10 = scmp.ne.s32.totalorder %s2336_s25, %s2332_s24  ;;  %p3242_p13 = scmp.eq.s32.totalorder %s2497_s9, 0 }
  0x30   : > { %p1853_p0 = scmp.ge.s32.totalorder %s2352_s29, 1  ;;  %p244_p1 = scmp.lt.s32.totalorder %s2352_s29, 3 }
  0x31   : > { %p2506_p2 = por %p3242_p13, %p75_p10  ;;  %s2358_s17 = smov [#allocation4]  }
  0x32   : > { %p2510_p3 = pnand %p1853_p0, %p244_p1  ;;  %s256_s19 = sshll.u32 %s2358_s17, 4  ;;  %s2514_s19 = int_to_ptr.vmem [resolvable:$true] %s256_s19 }
  0x33   : > { %s3253_s13 = scalar_select %p2506_p2, 1, 0 }
  0x34   : > { %s3254_s14 = scalar_select %p2510_p3, 1, 0 }
  0x35   : > { %p2002_p4 = pneg %p2510_p3  ;;  %s1861_s24 = sshll.u32 %s284_s11, 7 }
  0x36   : > { %s1925_s10 = sshll.u32 %s2348_s28, 11  ;;  %s323_s8 = scalar_lea.vmem [#allocation9], %s1861_s24 }
  0x37   : > { %p2523_p5 = pnand %p2002_p4, %p3242_p13  ;;  %s2530_s23 = scalar_lea.hbm %s3235_s4, %s1925_s10 }
  0x38   : > { %s331_s17 = sshll.u32 %s323_s8, 4  ;;  %s2210_s11 = scalar_lea.hbm %s3231_s0, 4096  ;;  %s2532_s17 = int_to_ptr.vmem [resolvable:$true] %s331_s17 }
  0x39   : > { %p2211_p7 = scmp.ne.s32.totalorder %s3231_s0, %s2210_s11  ;;  %p2212_p9 = pneg %p2523_p5 }
  0x3a   : > { %p2217_p10 = scmp.lt.u32.totalorder %s2210_s11, %s3231_s0 }
  0x3b   : > { %p2213_p11 = pnand %p2212_p9, %p2211_p7 }
  0x3d   : > { %p2214_p12 = pneg %p2213_p11 }
  0x3f   : > { %p2219_p0 = pnand %p2217_p10, %p2214_p12 }
  0x41   : > { %2222 = shalt.err (!%p2219_p0)
}
  0x42   : > { %s2223_s24 = scalar_lea.vmem %s2514_s19, 4096  ;;  %p2231_p8 = scmp.lt.s32.totalorder %s2514_s19, %s2514_s19 }
  0x43   : > { %p2224_p1 = scmp.ne.s32.totalorder %s2514_s19, %s2223_s24  ;;  %p2232_p2 = scmp.lt.s32.totalorder %s2223_s24, %s2223_s24 }
  0x45   : > { %p2226_p4 = pnand %p2224_p1, %p2212_p9  ;;  %p2233_p3 = por %p2232_p2, %p2231_p8 }
  0x47   : > { %p2227_p13 = pneg %p2226_p4 }
  0x49   : > { %p2234_p6 = pnand %p2233_p3, %p2227_p13 }
  0x4b   : > { %2237 = shalt.err (!%p2234_p6)
}
  0x4c   : > { %s2359_s1 = smov 16   ;;  %s3256_s28 = smov 256  }
  0x4d   : > { %2005 = dma.hbm_to_vmem [thread:$0]  (!%p2523_p5), %s3231_s0, 4096, %s2514_s19, [#allocation5], %s3256_s28, %s3256_s28, %s2359_s1  }
  0x4e   : > { %s2238_s10 = scalar_lea.hbm %s2530_s23, 2048  ;;  %p3257_p8 = scmp.ne.s32.totalorder %s3252_s20, 0 }
  0x4f   : > { %p2239_p7 = scmp.ne.s32.totalorder %s2530_s23, %s2238_s10  ;;  %s2243_s11 = scalar_lea.hbm %s3235_s4, 4096 }
  0x50   : > { %p3258_p13 = pneg %p3257_p8  ;;  %p2244_p3 = scmp.lt.u32.totalorder %s2530_s23, %s3235_s4 }
  0x51   : > { %p2245_p9 = scmp.lt.u32.totalorder %s2243_s11, %s2238_s10  ;;  %p2247_p12 = scmp.lt.u32.totalorder %s2238_s10, %s2530_s23 }
  0x52   : > { %p2241_p6 = pnand %p2239_p7, %p3258_p13 }
  0x53   : > { %p2246_p11 = por %p2245_p9, %p2244_p3 }
  0x54   : > { %p2242_p2 = pneg %p2241_p6 }
  0x55   : > { %p2248_p10 = por %p2247_p12, %p2246_p11 }
  0x57   : > { %p2249_p0 = pnand %p2248_p10, %p2242_p2 }
  0x59   : > { %2252 = shalt.err (!%p2249_p0)
}
  0x5a   : > { %s2253_s19 = scalar_lea.vmem %s2532_s17, 2048  ;;  %p3259_p1 = pmov %p3258_p13 }
  0x5b   : > { %p2254_p5 = scmp.ne.s32.totalorder %s2532_s17, %s2253_s19  ;;  %s2360_s24 = smov [#allocation9]  }
  0x5c   : > { %s2258_s1 = sshll.u32 %s2360_s24, 4  ;;  %s2259_s1 = int_to_ptr.vmem [resolvable:$false] %s2258_s1 }
  0x5d   : > { %p2256_p4 = pnand %p2254_p5, %p3259_p1  ;;  %s2260_s28 = scalar_lea.vmem %s2259_s1, 4096 }
  0x5e   : > { %p2261_p13 = scmp.lt.s32.totalorder %s2532_s17, %s2259_s1  ;;  %p2262_p6 = scmp.lt.s32.totalorder %s2260_s28, %s2253_s19 }
  0x5f   : > { %p2257_p7 = pneg %p2256_p4 }
  0x60   : > { %p2263_p3 = por %p2262_p6, %p2261_p13 }
  0x62   : > { %p2264_p9 = pnand %p2263_p3, %p2257_p7 }
  0x64   : > { %2267 = shalt.err (!%p2264_p9)
}
  0x65   : > { %s2361_s30 = smov 64   ;;  %s2362_s22 = smov 4  }
  0x66   : > { %2012 = dma.hbm_to_vmem [thread:$0]  (!%p3257_p8), %s2530_s23, 2048, %s2532_s17, %s2467_s21, %s2361_s30, %s2361_s30, %s2362_s22  }
  0x67   : > { %p3260_p2 = scmp.ne.s32.totalorder %s3254_s14, 0 }
  0x68   : > { %p3261_p11 = scmp.eq.s32.totalorder (!%p3260_p2), %s2497_s9, 0 }
  0x69   : > { %343 = sbr.rel (%p3260_p2) target bundleno = 1077 (0x435), region = 48 }
  0x70   : > { %2319 = dma.done.wait (%p3261_p11), [#allocation5], 4096   ;;  %p3262_p12 = pmov %p3261_p11 }
  0x71   : > { %s349_s10 = sand.u32 1, %s2497_s9   ;;  %s351_s8 = sand.u32 1, %s2336_s25  }
  0x72   : > { %2321 = vsyncadd (%p3262_p12), [#allocation5], 4294963200  ;;  %s1866_s15 = sshll.u32 %s351_s8, 8  ;;  %s350_s11 = scalar_lea.sflag [#allocation8], %s349_s10 }
  0x73   : > { %s2589_s16 = scalar_lea.vmem [#allocation7], %s1866_s15  ;;  %p3263_p10 = scmp.ne.s32.totalorder %s3253_s13, 0 }
  0x75   : > { %2323 = dma.done.wait (%p3263_p10), %s350_s11, 6144  }
  0x76   : > { %2325 = vsyncadd (%p3263_p10), %s350_s11, 4294961152  ;;  %s1867_s20 = sshll.u32 %s351_s8, 7  ;;  %s1868_s21 = sshll.u32 %s2344_s27, 1 }
  0x77   : > { %p409_p8 = scmp.lt.s32.totalorder %s1868_s21, 3  ;;  %s2606_s1 = scalar_lea.vmem [#allocation9], %s1867_s20 }
  0x78   : > { %p1870_p0 = scmp.ne.s32.totalorder %s2344_s27, 0 }
  0x79   : > { %s3272_s21 = smov (!%p409_p8, %s1868_s21), 3  ;;  %v2609_v0 = vld [vmem:[#allocation4 + $0x20] sm:$0xff] (!%p1870_p0)  ;;  %v2611_v1 = vld [vmem:[#allocation4 + $0x28] sm:$0xff] (!%p1870_p0)  ;;  %v2623_v7 = vld [vmem:[#allocation4 + $0x30] sm:$0xff] (!%p1870_p0) }
  0x7a   : > { %s411_s17 = scalar_lea.vmem %s3233_s2, %s3272_s21  ;;  %s416_s24 = scalar_lea.vmem %s3234_s3, %s3272_s21  ;;  %v2613_v2 = vld [vmem:[#allocation4] sm:$0xff] (!%p1870_p0)  ;;  %v466_v3 = vmul.f32 (!%p1870_p0), %v2609_v0, %v2609_v0  ;;  %v467_v4 = vmul.f32 (!%p1870_p0), %v2611_v1, %v2611_v1  ;;  %v2619_v5 = vld [vmem:[#allocation4 + $0x8] sm:$0xff] (!%p1870_p0)  ;;  %v2625_v8 = vld [vmem:[#allocation4 + $0x38] sm:$0xff] (!%p1870_p0)  ;;  %v468_v10 = vmul.f32 (!%p1870_p0), %v2623_v7, %v2623_v7 }
  0x7b   : > { %429 = sbr.rel (%p1870_p0) target bundleno = 315 (0x13b), region = 64  ;;  %v462_v6 = vmul.f32 (!%p1870_p0), %v2613_v2, %v2613_v2  ;;  %v463_v9 = vmul.f32 (!%p1870_p0), %v2619_v5, %v2619_v5  ;;  %v469_v11 = vmul.f32 (!%p1870_p0), %v2625_v8, %v2625_v8  ;;  %v2633_v12 = vld [vmem:[#allocation4 + $0x10] sm:$0xff] (!%p1870_p0)  ;;  %v2635_v13 = vld [vmem:[#allocation4 + $0x18] sm:$0xff] (!%p1870_p0)  ;;  %v2645_v19 = vld [vmem:[#allocation4 + $0x40] sm:$0xff] (!%p1870_p0) }
  0x7c   : > { %v2637_v14 = vld [vmem:[#allocation4 + $0x50] sm:$0xff] (!%p1870_p0)  ;;  %v500_v15 = vadd.f32 (!%p1870_p0), %v467_v4, %v466_v3  ;;  %v464_v16 = vmul.f32 (!%p1870_p0), %v2633_v12, %v2633_v12  ;;  %v465_v17 = vmul.f32 (!%p1870_p0), %v2635_v13, %v2635_v13  ;;  %v2643_v18 = vld [vmem:[#allocation4 + $0x58] sm:$0xff] (!%p1870_p0)  ;;  %v2647_v20 = vld [vmem:[#allocation4 + $0x48] sm:$0xff] (!%p1870_p0)  ;;  %v470_v26 = vmul.f32 (!%p1870_p0), %v2645_v19, %v2645_v19 }
  0x7d   : > { %v494_v21 = vadd.f32 (!%p1870_p0), %v463_v9, %v462_v6  ;;  %v503_v22 = vadd.f32 (!%p1870_p0), %v469_v11, %v468_v10  ;;  %v472_v23 = vmul.f32 (!%p1870_p0), %v2637_v14, %v2637_v14  ;;  %v473_v24 = vmul.f32 (!%p1870_p0), %v2643_v18, %v2643_v18  ;;  %v2657_v28 = vld [vmem:[#allocation4 + $0x70] sm:$0xff] (!%p1870_p0)  ;;  %v2659_v29 = vld [vmem:[#allocation4 + $0x78] sm:$0xff] (!%p1870_p0)  ;;  %v2661_v30 = vld [vmem:[#allocation4 + $0x60] sm:$0xff] (!%p1870_p0) }
  0x7e   : > { %501 = vadd.xlane.f32.xlu1 (!%p1870_p0), %v500_v15  ;;  %v497_v25 = vadd.f32 (!%p1870_p0), %v465_v17, %v464_v16  ;;  %v471_v27 = vmul.f32 (!%p1870_p0), %v2647_v20, %v2647_v20  ;;  %v2663_v31 = vld [vmem:[#allocation4 + $0x68] sm:$0xff] (!%p1870_p0)  ;;  %v476_v33 = vmul.f32 (!%p1870_p0), %v2657_v28, %v2657_v28  ;;  %v477_v34 = vmul.f32 (!%p1870_p0), %v2659_v29, %v2659_v29  ;;  %v2673_v38 = vld [vmem:[#allocation4 + $0x90] sm:$0xff] (!%p1870_p0)  ;;  %v2675_v39 = vld [vmem:[#allocation4 + $0x98] sm:$0xff] (!%p1870_p0) }
  0x7f   : > { %495 = vadd.xlane.f32.xlu0 (!%p1870_p0), %v494_v21  ;;  %v509_v32 = vadd.f32 (!%p1870_p0), %v473_v24, %v472_v23  ;;  %v474_v36 = vmul.f32 (!%p1870_p0), %v2661_v30, %v2661_v30  ;;  %v475_v37 = vmul.f32 (!%p1870_p0), %v2663_v31, %v2663_v31  ;;  %v2677_v40 = vld [vmem:[#allocation4 + $0x80] sm:$0xff] (!%p1870_p0)  ;;  %v2679_v41 = vld [vmem:[#allocation4 + $0x88] sm:$0xff] (!%p1870_p0)  ;;  %v480_v43 = vmul.f32 (!%p1870_p0), %v2673_v38, %v2673_v38  ;;  %v2689_v48 = vld [vmem:[#allocation4 + $0xb0] sm:$0xff] (!%p1870_p0) }
  0x80   : > { %v506_v35 = vadd.f32 (!%p1870_p0), %v471_v27, %v470_v26  ;;  %v515_v42 = vadd.f32 (!%p1870_p0), %v477_v34, %v476_v33  ;;  %v481_v44 = vmul.f32 (!%p1870_p0), %v2675_v39, %v2675_v39  ;;  %v478_v46 = vmul.f32 (!%p1870_p0), %v2677_v40, %v2677_v40  ;;  %v2691_v49 = vld [vmem:[#allocation4 + $0xb8] sm:$0xff] (!%p1870_p0)  ;;  %v2693_v50 = vld [vmem:[#allocation4 + $0xa0] sm:$0xff] (!%p1870_p0)  ;;  %v2695_v51 = vld [vmem:[#allocation4 + $0xa8] sm:$0xff] (!%p1870_p0) }
  0x81   : > { %v512_v45 = vadd.f32 (!%p1870_p0), %v475_v37, %v474_v36  ;;  %v479_v47 = vmul.f32 (!%p1870_p0), %v2679_v41, %v2679_v41  ;;  %v484_v53 = vmul.f32 (!%p1870_p0), %v2689_v48, %v2689_v48  ;;  %v485_v54 = vmul.f32 (!%p1870_p0), %v2691_v49, %v2691_v49  ;;  %v2705_v58 = vld [vmem:[#allocation4 + $0xd0] sm:$0xff] (!%p1870_p0)  ;;  %v2707_v59 = vld [vmem:[#allocation4 + $0xd8] sm:$0xff] (!%p1870_p0)  ;;  %v2709_v60 = vld [vmem:[#allocation4 + $0xc0] sm:$0xff] (!%p1870_p0) }
  0x82   : > { %504 = vadd.xlane.f32.xlu1 %v503_v22  ;;  %v521_v52 = vadd.f32 %v481_v44, %v480_v43  ;;  %v482_v56 = vmul.f32 %v2693_v50, %v2693_v50  ;;  %v483_v57 = vmul.f32 %v2695_v51, %v2695_v51  ;;  %v2711_v61 = vld [vmem:[#allocation4 + $0xc8] sm:$0xff]  ;;  %v488_v63 = vmul.f32 %v2705_v58, %v2705_v58  ;;  %v2721_v10 = vld [vmem:[#allocation4 + $0xf0] sm:$0xff]  ;;  %v2723_v11 = vld [vmem:[#allocation4 + $0xf8] sm:$0xff] }
  0x83   : > { %498 = vadd.xlane.f32.xlu0 %v497_v25  ;;  %v518_v55 = vadd.f32 %v479_v47, %v478_v46  ;;  %v527_v62 = vadd.f32 %v485_v54, %v484_v53  ;;  %v489_v3 = vmul.f32 %v2707_v59, %v2707_v59  ;;  %v486_v6 = vmul.f32 %v2709_v60, %v2709_v60  ;;  %v2725_v15 = vld [vmem:[#allocation4 + $0xe0] sm:$0xff]  ;;  %v2727_v16 = vld [vmem:[#allocation4 + $0xe8] sm:$0xff] }
  0x84   : > { %v524_v4 = vadd.f32 %v483_v57, %v482_v56  ;;  %v487_v9 = vmul.f32 %v2711_v61, %v2711_v61  ;;  %v492_v21 = vmul.f32 %v2721_v10, %v2721_v10  ;;  %v493_v22 = vmul.f32 %v2723_v11, %v2723_v11 }
  0x85   : > { %v533_v17 = vadd.f32 %v489_v3, %v488_v63  ;;  %v490_v24 = vmul.f32 %v2725_v15, %v2725_v15  ;;  %v491_v25 = vmul.f32 %v2727_v16, %v2727_v16 }
  0x86   : > { %510 = vadd.xlane.f32.xlu1 %v509_v32  ;;  %v530_v23 = vadd.f32 %v487_v9, %v486_v6  ;;  %v539_v26 = vadd.f32 %v493_v22, %v492_v21  ;;  %v2363_v32 = vmov 0.0  }
  0x87   : > { %507 = vadd.xlane.f32.xlu0 %v506_v35  ;;  %v536_v27 = vadd.f32 %v491_v25, %v490_v24  ;;  %638 = vst [vmem:[#allocation3] sm:$0xff] %v2363_v32  ;;  %639 = vst [vmem:[#allocation3 + $0x8] sm:$0xff] %v2363_v32 }
  0x88   : > { %640 = vst [vmem:[#allocation3 + $0x10] sm:$0xff] %v2363_v32  ;;  %641 = vst [vmem:[#allocation3 + $0x18] sm:$0xff] %v2363_v32 }
  0x89   : > { %642 = vst [vmem:[#allocation3 + $0x20] sm:$0xff] %v2363_v32  ;;  %643 = vst [vmem:[#allocation3 + $0x28] sm:$0xff] %v2363_v32 }
  0x8a   : > { %516 = vadd.xlane.f32.xlu1 %v515_v42  ;;  %644 = vst [vmem:[#allocation3 + $0x30] sm:$0xff] %v2363_v32  ;;  %645 = vst [vmem:[#allocation3 + $0x38] sm:$0xff] %v2363_v32 }
  0x8b   : > { %513 = vadd.xlane.f32.xlu0 %v512_v45  ;;  %646 = vst [vmem:[#allocation3 + $0x40] sm:$0xff] %v2363_v32  ;;  %647 = vst [vmem:[#allocation3 + $0x48] sm:$0xff] %v2363_v32 }
  0x8c   : > { %648 = vst [vmem:[#allocation3 + $0x50] sm:$0xff] %v2363_v32  ;;  %649 = vst [vmem:[#allocation3 + $0x58] sm:$0xff] %v2363_v32 }
  0x8d   : > { %650 = vst [vmem:[#allocation3 + $0x60] sm:$0xff] %v2363_v32  ;;  %651 = vst [vmem:[#allocation3 + $0x68] sm:$0xff] %v2363_v32 }
  0x8e   : > { %522 = vadd.xlane.f32.xlu1 %v521_v52  ;;  %652 = vst [vmem:[#allocation3 + $0x70] sm:$0xff] %v2363_v32  ;;  %653 = vst [vmem:[#allocation3 + $0x78] sm:$0xff] %v2363_v32 }
  0x8f   : > { %519 = vadd.xlane.f32.xlu0 %v518_v55 }
  0x92   : > { %528 = vadd.xlane.f32.xlu1 %v527_v62 }
  0x93   : > { %525 = vadd.xlane.f32.xlu0 %v524_v4 }
  0x96   : > { %534 = vadd.xlane.f32.xlu1 %v533_v17 }
  0x97   : > { %531 = vadd.xlane.f32.xlu0 %v530_v23 }
  0x9a   : > { %540 = vadd.xlane.f32.xlu1 %v539_v26 }
  0x9b   : > { %537 = vadd.xlane.f32.xlu0 %v536_v27 }
 0x10b   : > { %v502_v33 = vpop.xlane.xlu1 %501 }
 0x10c   : > { %v544_v34 = vmax.f32 %v502_v33, 1e-24  ;;  %v496_v35 = vpop.xlane.xlu0 %495 }
 0x10d   : > { %v542_v36 = vmax.f32 %v496_v35, 1e-24 }
 0x10e   : > { %2078 = vrsqrt.f32 %v544_v34 }
 0x10f   : > { %v505_v37 = vpop.xlane.xlu1 %504  ;;  %2080 = vrsqrt.f32 %v542_v36 }
 0x110   : > { %v545_v42 = vmax.f32 %v505_v37, 1e-24  ;;  %v499_v43 = vpop.xlane.xlu0 %498 }
 0x111   : > { %v543_v44 = vmax.f32 %v499_v43, 1e-24 }
 0x112   : > { %2082 = vrsqrt.f32 %v545_v42 }
 0x113   : > { %2084 = vrsqrt.f32 %v543_v44  ;;  %v511_v45 = vpop.xlane.xlu1 %510 }
 0x114   : > { %v547_v46 = vmax.f32 %v511_v45, 1e-24  ;;  %v508_v47 = vpop.xlane.xlu0 %507 }
 0x115   : > { %v546_v52 = vmax.f32 %v508_v47, 1e-24 }
 0x116   : > { %2086 = vrsqrt.f32 %v547_v46 }
 0x117   : > { %2088 = vrsqrt.f32 %v546_v52  ;;  %v517_v53 = vpop.xlane.xlu1 %516 }
 0x118   : > { %v549_v54 = vmax.f32 %v517_v53, 1e-24  ;;  %v514_v55 = vpop.xlane.xlu0 %513  ;;  %v2079_v56 = vpop.eup %2078 }
 0x119   : > { %v548_v57 = vmax.f32 %v514_v55, 1e-24  ;;  %v2081_v62 = vpop.eup %2080  ;;  %v578_v4 = vmul.f32 %v2079_v56, %v2609_v0  ;;  %v579_v6 = vmul.f32 %v2079_v56, %v2611_v1 }
 0x11a   : > { %2090 = vrsqrt.f32 %v549_v54  ;;  %v574_v22 = vmul.f32 %v2081_v62, %v2613_v2  ;;  %v575_v26 = vmul.f32 %v2081_v62, %v2619_v5 }
 0x11b   : > { %2092 = vrsqrt.f32 %v548_v57  ;;  %v523_v63 = vpop.xlane.xlu1 %522 }
 0x11c   : > { %v2083_v3 = vpop.eup %2082  ;;  %v551_v9 = vmax.f32 %v523_v63, 1e-24  ;;  %v520_v17 = vpop.xlane.xlu0 %519 }
 0x11d   : > { %v2085_v21 = vpop.eup %2084  ;;  %v580_v23 = vmul.f32 %v2083_v3, %v2623_v7  ;;  %v581_v24 = vmul.f32 %v2083_v3, %v2625_v8  ;;  %v550_v25 = vmax.f32 %v520_v17, 1e-24 }
 0x11e   : > { %v576_v27 = vmul.f32 %v2085_v21, %v2633_v12  ;;  %v577_v32 = vmul.f32 %v2085_v21, %v2635_v13  ;;  %2094 = vrsqrt.f32 %v551_v9 }
 0x11f   : > { %v608_v0 = vpack.c.bf16 %v580_v23, %v578_v4  ;;  %v609_v33 = vpack.c.bf16 %v581_v24, %v579_v6  ;;  %2096 = vrsqrt.f32 %v550_v25  ;;  %v529_v1 = vpop.xlane.xlu1 %528 }
 0x120   : > { %v2087_v34 = vpop.eup %2086  ;;  %v606_v35 = vpack.c.bf16 %v576_v27, %v574_v22  ;;  %v607_v36 = vpack.c.bf16 %v577_v32, %v575_v26  ;;  %v553_v2 = vmax.f32 %v529_v1, 1e-24  ;;  %v526_v37 = vpop.xlane.xlu0 %525 }
 0x121   : > { %v2089_v7 = vpop.eup %2088  ;;  %624 = vst [vmem:[#allocation2 + $0x10] sm:$0xff] %v608_v0  ;;  %625 = vst [vmem:[#allocation2 + $0x18] sm:$0xff] %v609_v33  ;;  %v584_v8 = vmul.f32 %v2087_v34, %v2637_v14  ;;  %v585_v5 = vmul.f32 %v2087_v34, %v2643_v18  ;;  %v552_v12 = vmax.f32 %v526_v37, 1e-24 }
 0x122   : > { %622 = vst [vmem:[#allocation2] sm:$0xff] %v606_v35  ;;  %623 = vst [vmem:[#allocation2 + $0x8] sm:$0xff] %v607_v36  ;;  %v582_v13 = vmul.f32 %v2089_v7, %v2645_v19  ;;  %v583_v42 = vmul.f32 %v2089_v7, %v2647_v20  ;;  %2098 = vrsqrt.f32 %v553_v2 }
 0x123   : > { %2100 = vrsqrt.f32 %v552_v12  ;;  %v535_v43 = vpop.xlane.xlu1 %534 }
 0x124   : > { %v2091_v44 = vpop.eup %2090  ;;  %v610_v45 = vpack.c.bf16 %v584_v8, %v582_v13  ;;  %v611_v46 = vpack.c.bf16 %v585_v5, %v583_v42  ;;  %v555_v47 = vmax.f32 %v535_v43, 1e-24  ;;  %v532_v52 = vpop.xlane.xlu0 %531 }
 0x125   : > { %v2093_v53 = vpop.eup %2092  ;;  %v588_v14 = vmul.f32 %v2091_v44, %v2657_v28  ;;  %v589_v18 = vmul.f32 %v2091_v44, %v2659_v29  ;;  %v554_v54 = vmax.f32 %v532_v52, 1e-24 }
 0x126   : > { %626 = vst [vmem:[#allocation2 + $0x20] sm:$0xff] %v610_v45  ;;  %627 = vst [vmem:[#allocation2 + $0x28] sm:$0xff] %v611_v46  ;;  %v586_v19 = vmul.f32 %v2093_v53, %v2661_v30  ;;  %v587_v20 = vmul.f32 %v2093_v53, %v2663_v31  ;;  %2102 = vrsqrt.f32 %v555_v47 }
 0x127   : > { %2104 = vrsqrt.f32 %v554_v54  ;;  %v541_v55 = vpop.xlane.xlu1 %540 }
 0x128   : > { %v2095_v56 = vpop.eup %2094  ;;  %v612_v57 = vpack.c.bf16 %v588_v14, %v586_v19  ;;  %v613_v62 = vpack.c.bf16 %v589_v18, %v587_v20  ;;  %v557_v63 = vmax.f32 %v541_v55, 1e-24  ;;  %v538_v3 = vpop.xlane.xlu0 %537 }
 0x129   : > { %v2097_v4 = vpop.eup %2096  ;;  %v592_v28 = vmul.f32 %v2095_v56, %v2673_v38  ;;  %v593_v29 = vmul.f32 %v2095_v56, %v2675_v39  ;;  %v556_v6 = vmax.f32 %v538_v3, 1e-24 }
 0x12a   : > { %628 = vst [vmem:[#allocation2 + $0x30] sm:$0xff] %v612_v57  ;;  %629 = vst [vmem:[#allocation2 + $0x38] sm:$0xff] %v613_v62  ;;  %v590_v30 = vmul.f32 %v2097_v4, %v2677_v40  ;;  %v591_v31 = vmul.f32 %v2097_v4, %v2679_v41  ;;  %2106 = vrsqrt.f32 %v557_v63 }
 0x12b   : > { %2108 = vrsqrt.f32 %v556_v6 }
 0x12c   : > { %v2099_v9 = vpop.eup %2098  ;;  %v614_v17 = vpack.c.bf16 %v592_v28, %v590_v30  ;;  %v615_v21 = vpack.c.bf16 %v593_v29, %v591_v31 }
 0x12d   : > { %v2101_v22 = vpop.eup %2100  ;;  %v596_v23 = vmul.f32 %v2099_v9, %v2689_v48  ;;  %v597_v24 = vmul.f32 %v2099_v9, %v2691_v49 }
 0x12e   : > { %630 = vst [vmem:[#allocation2 + $0x40] sm:$0xff] %v614_v17  ;;  %631 = vst [vmem:[#allocation2 + $0x48] sm:$0xff] %v615_v21  ;;  %v594_v38 = vmul.f32 %v2101_v22, %v2693_v50  ;;  %v595_v39 = vmul.f32 %v2101_v22, %v2695_v51 }
 0x130   : > { %v2103_v25 = vpop.eup %2102  ;;  %v616_v40 = vpack.c.bf16 %v596_v23, %v594_v38  ;;  %v617_v26 = vpack.c.bf16 %v597_v24, %v595_v39 }
 0x131   : > { %v2105_v41 = vpop.eup %2104  ;;  %v600_v27 = vmul.f32 %v2103_v25, %v2705_v58  ;;  %v601_v32 = vmul.f32 %v2103_v25, %v2707_v59 }
 0x132   : > { %632 = vst [vmem:[#allocation2 + $0x50] sm:$0xff] %v616_v40  ;;  %633 = vst [vmem:[#allocation2 + $0x58] sm:$0xff] %v617_v26  ;;  %v598_v48 = vmul.f32 %v2105_v41, %v2709_v60  ;;  %v599_v49 = vmul.f32 %v2105_v41, %v2711_v61 }
 0x134   : > { %v2107_v0 = vpop.eup %2106  ;;  %v618_v33 = vpack.c.bf16 %v600_v27, %v598_v48  ;;  %v619_v1 = vpack.c.bf16 %v601_v32, %v599_v49 }
 0x135   : > { %v2109_v50 = vpop.eup %2108  ;;  %v604_v51 = vmul.f32 %v2107_v0, %v2721_v10  ;;  %v605_v34 = vmul.f32 %v2107_v0, %v2723_v11 }
 0x136   : > { %634 = vst [vmem:[#allocation2 + $0x60] sm:$0xff] %v618_v33  ;;  %635 = vst [vmem:[#allocation2 + $0x68] sm:$0xff] %v619_v1  ;;  %v602_v58 = vmul.f32 %v2109_v50, %v2725_v15  ;;  %v603_v59 = vmul.f32 %v2109_v50, %v2727_v16 }
 0x138   : > { %v620_v35 = vpack.c.bf16 %v604_v51, %v602_v58  ;;  %v621_v36 = vpack.c.bf16 %v605_v34, %v603_v59 }
 0x13a   : > { %636 = vst [vmem:[#allocation2 + $0x70] sm:$0xff] %v620_v35  ;;  %637 = vst [vmem:[#allocation2 + $0x78] sm:$0xff] %v621_v36 }
 0x13b PF: > { %v2110_v60 = vld [vmem:[%s2589_s16 + $0x4] ss:$8 sps:$4 sm:$0xff]   ;;  %v2112_v61 = vld [vmem:[%s2589_s16] ss:$8 sps:$4 sm:$0xff]   ;;  %v2113_v10 = vld [vmem:[%s2589_s16 + $0x14] ss:$8 sps:$4 sm:$0xff]  }
 0x13c   : > { %862 = vmatprep.subr.bf16.mxu0 %v2110_v60  ;;  %v2115_v11 = vld [vmem:[%s2589_s16 + $0x10] ss:$8 sps:$4 sm:$0xff]   ;;  %v2116_v15 = vld [vmem:[%s2589_s16 + $0x24] ss:$8 sps:$4 sm:$0xff]   ;;  %v2118_v16 = vld [vmem:[%s2589_s16 + $0x20] ss:$8 sps:$4 sm:$0xff]  }
 0x13d   : > { %863 = vmatpush1.bf16.msra.mxu0 %v2112_v61  ;;  %v2119_v2 = vld [vmem:[%s2589_s16 + $0x34] ss:$8 sps:$4 sm:$0xff]   ;;  %v2121_v37 = vld [vmem:[%s2589_s16 + $0x30] ss:$8 sps:$4 sm:$0xff]   ;;  %v2122_v7 = vld [vmem:[%s2589_s16 + $0x44] ss:$8 sps:$4 sm:$0xff]  }
 0x13e   : > { %864 = vmatprep.subr.bf16.mxu0 %v2113_v10  ;;  %v2124_v8 = vld [vmem:[%s2589_s16 + $0x40] ss:$8 sps:$4 sm:$0xff]   ;;  %v2125_v5 = vld [vmem:[%s2589_s16 + $0x54] ss:$8 sps:$4 sm:$0xff]   ;;  %v2127_v12 = vld [vmem:[%s2589_s16 + $0x50] ss:$8 sps:$4 sm:$0xff]  }
 0x13f   : > { %v2128_v13 = vld [vmem:[%s2589_s16 + $0x64] ss:$8 sps:$4 sm:$0xff]   ;;  %v2130_v43 = vld [vmem:[%s2589_s16 + $0x60] ss:$8 sps:$4 sm:$0xff]   ;;  %v2131_v44 = vld [vmem:[%s2589_s16 + $0x74] ss:$8 sps:$4 sm:$0xff]  }
 0x140   : > { %v655_v42 = vld [vmem:[#allocation2 + $0x8] sm:$0xff]  ;;  %v2133_v45 = vld [vmem:[%s2589_s16 + $0x70] ss:$8 sps:$4 sm:$0xff]   ;;  %v2137_v52 = vld [vmem:[%s2589_s16 + $0x94] ss:$8 sps:$4 sm:$0xff]   ;;  %p1919_p5 = scmp.ne.s32.totalorder %s2344_s27, 1 }
 0x141   : > { %865 = vmatpush1.bf16.msra.mxu0 %v2115_v11  ;;  %894 = vmatprep.mubr.bf16.mxu0 %v655_v42  ;;  %v2134_v46 = vld [vmem:[%s2589_s16 + $0x84] ss:$8 sps:$4 sm:$0xff]   ;;  %v2136_v47 = vld [vmem:[%s2589_s16 + $0x80] ss:$8 sps:$4 sm:$0xff]   ;;  %v2139_v53 = vld [vmem:[%s2589_s16 + $0x90] ss:$8 sps:$4 sm:$0xff]  }
 0x142   : > { %866 = vmatprep.subr.bf16.mxu0 %v2116_v15  ;;  %v2140_v14 = vld [vmem:[%s2589_s16 + $0xa4] ss:$8 sps:$4 sm:$0xff]   ;;  %v2142_v18 = vld [vmem:[%s2589_s16 + $0xa0] ss:$8 sps:$4 sm:$0xff]   ;;  %v2143_v54 = vld [vmem:[%s2589_s16 + $0xb4] ss:$8 sps:$4 sm:$0xff]  }
 0x143   : > { %v2145_v19 = vld [vmem:[%s2589_s16 + $0xb0] ss:$8 sps:$4 sm:$0xff]   ;;  %v2146_v20 = vld [vmem:[%s2589_s16 + $0xc4] ss:$8 sps:$4 sm:$0xff]   ;;  %v2148_v55 = vld [vmem:[%s2589_s16 + $0xc0] ss:$8 sps:$4 sm:$0xff]  }
 0x144   : > { %v2149_v56 = vld [vmem:[%s2589_s16 + $0xd4] ss:$8 sps:$4 sm:$0xff]   ;;  %v2151_v57 = vld [vmem:[%s2589_s16 + $0xd0] ss:$8 sps:$4 sm:$0xff]   ;;  %v2152_v62 = vld [vmem:[%s2589_s16 + $0xe4] ss:$8 sps:$4 sm:$0xff]  }
 0x145   : > { %867 = vmatpush1.bf16.msra.mxu0 %v2118_v16  ;;  %v2154_v63 = vld [vmem:[%s2589_s16 + $0xe0] ss:$8 sps:$4 sm:$0xff]   ;;  %v2155_v3 = vld [vmem:[%s2589_s16 + $0xf4] ss:$8 sps:$4 sm:$0xff]   ;;  %v2157_v4 = vld [vmem:[%s2589_s16 + $0xf0] ss:$8 sps:$4 sm:$0xff]  }
 0x146   : > { %868 = vmatprep.subr.bf16.mxu0 %v2119_v2  ;;  %v654_v28 = vld [vmem:[#allocation2] sm:$0xff]  ;;  %v657_v29 = vld [vmem:[#allocation2 + $0x18] sm:$0xff]  ;;  %v656_v6 = vld [vmem:[#allocation2 + $0x10] sm:$0xff] }
 0x147   : > { %v659_v30 = vld [vmem:[#allocation2 + $0x28] sm:$0xff]  ;;  %v658_v31 = vld [vmem:[#allocation2 + $0x20] sm:$0xff]  ;;  %v661_v9 = vld [vmem:[#allocation2 + $0x38] sm:$0xff] }
 0x148   : > { %v660_v17 = vld [vmem:[#allocation2 + $0x30] sm:$0xff]  ;;  %v663_v21 = vld [vmem:[#allocation2 + $0x48] sm:$0xff]  ;;  %v662_v22 = vld [vmem:[#allocation2 + $0x40] sm:$0xff] }
 0x149   : > { %869 = vmatpush1.bf16.msra.mxu0 %v2121_v37  ;;  %v665_v23 = vld [vmem:[#allocation2 + $0x58] sm:$0xff]  ;;  %v664_v24 = vld [vmem:[#allocation2 + $0x50] sm:$0xff]  ;;  %v667_v38 = vld [vmem:[#allocation2 + $0x68] sm:$0xff] }
 0x14a   : > { %870 = vmatprep.subr.bf16.mxu0 %v2122_v7  ;;  %v666_v39 = vld [vmem:[#allocation2 + $0x60] sm:$0xff]  ;;  %v669_v25 = vld [vmem:[#allocation2 + $0x78] sm:$0xff]  ;;  %v668_v40 = vld [vmem:[#allocation2 + $0x70] sm:$0xff] }
 0x14b   : > { %v2158_v26 = vld [vmem:[%s2606_s1 + $0x40] sm:$0xff]   ;;  %v2160_v27 = vld [vmem:[%s2606_s1 + $0x48] sm:$0xff]   ;;  %v2162_v48 = vld [vmem:[%s2606_s1 + $0x50] sm:$0xff]  }
 0x14c   : > { %v2159_v41 = vld [vmem:[%s2606_s1] sm:$0xff]   ;;  %1926 = vmatprep.subr.bf16.mxu1 %v2158_v26  ;;  %v2161_v32 = vld [vmem:[%s2606_s1 + $0x8] sm:$0xff]   ;;  %v2163_v49 = vld [vmem:[%s2606_s1 + $0x10] sm:$0xff]  }
 0x14d   : > { %871 = vmatpush1.bf16.msra.mxu0 %v2124_v8  ;;  %1927 = vmatpush3.bf16.msra.mxu1 %v2159_v41  ;;  %v2164_v0 = vld [vmem:[%s2606_s1 + $0x58] sm:$0xff]   ;;  %v2166_v1 = vld [vmem:[%s2606_s1 + $0x60] sm:$0xff]   ;;  %v2168_v51 = vld [vmem:[%s2606_s1 + $0x68] sm:$0xff]  }
 0x14e   : > { %872 = vmatprep.subr.bf16.mxu0 %v2125_v5  ;;  %1928 = vmatprep.subr.bf16.mxu1 %v2160_v27  ;;  %v2165_v33 = vld [vmem:[%s2606_s1 + $0x18] sm:$0xff]   ;;  %v2167_v50 = vld [vmem:[%s2606_s1 + $0x20] sm:$0xff]   ;;  %v2169_v34 = vld [vmem:[%s2606_s1 + $0x28] sm:$0xff]  }
 0x14f   : > { %v2170_v58 = vld [vmem:[%s2606_s1 + $0x70] sm:$0xff]   ;;  %v2172_v35 = vld [vmem:[%s2606_s1 + $0x78] sm:$0xff]  }
 0x150   : > { %v2171_v59 = vld [vmem:[%s2606_s1 + $0x30] sm:$0xff]   ;;  %v2173_v36 = vld [vmem:[%s2606_s1 + $0x38] sm:$0xff]  }
 0x151   : > { %873 = vmatpush1.bf16.msra.mxu0 %v2127_v12  ;;  %1929 = vmatpush3.bf16.msra.mxu1 %v2161_v32 }
 0x152   : > { %874 = vmatprep.subr.bf16.mxu0 %v2128_v13  ;;  %1930 = vmatprep.subr.bf16.mxu1 %v2162_v48 }
 0x155   : > { %875 = vmatpush1.bf16.msra.mxu0 %v2130_v43  ;;  %1931 = vmatpush3.bf16.msra.mxu1 %v2163_v49 }
 0x156   : > { %876 = vmatprep.subr.bf16.mxu0 %v2131_v44  ;;  %1932 = vmatprep.subr.bf16.mxu1 %v2164_v0 }
 0x159   : > { %877 = vmatpush1.bf16.msra.mxu0 %v2133_v45  ;;  %1933 = vmatpush3.bf16.msra.mxu1 %v2165_v33 }
 0x15a   : > { %878 = vmatprep.subr.bf16.mxu0 %v2134_v46  ;;  %1934 = vmatprep.subr.bf16.mxu1 %v2166_v1 }
 0x15d   : > { %879 = vmatpush1.bf16.msra.mxu0 %v2136_v47  ;;  %1935 = vmatpush3.bf16.msra.mxu1 %v2167_v50 }
 0x15e   : > { %880 = vmatprep.subr.bf16.mxu0 %v2137_v52  ;;  %1936 = vmatprep.subr.bf16.mxu1 %v2168_v51 }
 0x161   : > { %881 = vmatpush1.bf16.msra.mxu0 %v2139_v53  ;;  %1937 = vmatpush3.bf16.msra.mxu1 %v2169_v34 }
 0x162   : > { %882 = vmatprep.subr.bf16.mxu0 %v2140_v14  ;;  %1938 = vmatprep.subr.bf16.mxu1 %v2170_v58 }
 0x165   : > { %883 = vmatpush1.bf16.msra.mxu0 %v2142_v18  ;;  %1939 = vmatpush3.bf16.msra.mxu1 %v2171_v59 }
 0x166   : > { %884 = vmatprep.subr.bf16.mxu0 %v2143_v54  ;;  %1940 = vmatprep.subr.bf16.mxu1 %v2172_v35 }
 0x169   : > { %885 = vmatpush1.bf16.msra.mxu0 %v2145_v19  ;;  %1941 = vmatpush3.bf16.msra.mxu1 %v2173_v36 }
 0x16a   : > { %886 = vmatprep.subr.bf16.mxu0 %v2146_v20 }
 0x16d   : > { %887 = vmatpush1.bf16.msra.mxu0 %v2148_v55 }
 0x16e   : > { %888 = vmatprep.subr.bf16.mxu0 %v2149_v56 }
 0x171   : > { %889 = vmatpush1.bf16.msra.mxu0 %v2151_v57 }
 0x172   : > { %890 = vmatprep.subr.bf16.mxu0 %v2152_v62 }
 0x175   : > { %891 = vmatpush1.bf16.msra.mxu0 %v2154_v63 }
 0x176   : > { %892 = vmatprep.subr.bf16.mxu0 %v2155_v3 }
 0x179   : > { %893 = vmatpush1.bf16.msra.mxu0 %v2157_v4 }
 0x17c   : > { %895 = vmatmul.mubr.bf16.vlgmr.msra.gmra.mrb[0].mxu0 %v654_v28 }
 0x17d   : > { %904 = vmatprep.mubr.bf16.mxu0 %v657_v29 }
 0x184   : > { %905 = vmatmul.mubr.bf16.gmra.mrb[4].mxu0 %v656_v6 }
 0x185   : > { %914 = vmatprep.mubr.bf16.mxu0 %v659_v30 }
 0x18c   : > { %915 = vmatmul.mubr.bf16.gmra.mrb[8].mxu0 %v658_v31 }
 0x18d   : > { %924 = vmatprep.mubr.bf16.mxu0 %v661_v9 }
 0x194   : > { %925 = vmatmul.mubr.bf16.gmra.mrb[12].mxu0 %v660_v17 }
 0x195   : > { %934 = vmatprep.mubr.bf16.mxu0 %v663_v21 }
 0x19c   : > { %935 = vmatmul.mubr.bf16.gmra.mrb[16].mxu0 %v662_v22 }
 0x19d   : > { %944 = vmatprep.mubr.bf16.mxu0 %v665_v23 }
 0x1a4   : > { %945 = vmatmul.mubr.bf16.gmra.mrb[20].mxu0 %v664_v24 }
 0x1a5   : > { %954 = vmatprep.mubr.bf16.mxu0 %v667_v38 }
 0x1ac   : > { %955 = vmatmul.mubr.bf16.gmra.mrb[24].mxu0 %v666_v39 }
 0x1ad   : > { %964 = vmatprep.mubr.bf16.mxu0 %v669_v25 }
 0x1b4   : > { %965 = vmatmul.mubr.bf16.gmra.mrb[28].mxu0 %v668_v40 }
 0x24f   : > { %v2817_v60 = vpop.f32.mrb[0].mxu0 }
 0x250   : > { %v2819_v61 = vpop.f32.mrb[1].mxu0  ;;  %v1017_v11 = vmul.f32 %v2817_v60, %v2817_v60 }
 0x251   : > { %v2821_v10 = vpop.f32.mrb[2].mxu0  ;;  %v1018_v37 = vmul.f32 %v2819_v61, %v2819_v61 }
 0x252   : > { %v975_v15 = vadd.f32 %v2821_v10, %v2817_v60  ;;  %v1019_v16 = vmul.f32 %v2821_v10, %v2821_v10  ;;  %v2829_v2 = vpop.f32.mrb[3].mxu0 }
 0x253   : > { %v996_v7 = vadd.f32 %v2829_v2, %v2819_v61  ;;  %v1020_v8 = vmul.f32 %v2829_v2, %v2829_v2 }
 0x254   : > { %v1049_v5 = vadd.f32 %v1019_v16, %v1017_v11 }
 0x255   : > { %v1070_v12 = vadd.f32 %v1020_v8, %v1018_v37 }
 0x257   : > { %v2837_v13 = vpop.f32.mrb[4].mxu0 }
 0x258   : > { %v976_v42 = vadd.f32 %v975_v15, %v2837_v13  ;;  %v1021_v43 = vmul.f32 %v2837_v13, %v2837_v13  ;;  %v2842_v44 = vpop.f32.mrb[5].mxu0 }
 0x259   : > { %v997_v45 = vadd.f32 %v996_v7, %v2842_v44  ;;  %v1022_v46 = vmul.f32 %v2842_v44, %v2842_v44  ;;  %v2847_v47 = vpop.f32.mrb[6].mxu0 }
 0x25a   : > { %v1050_v52 = vadd.f32 %v1049_v5, %v1021_v43  ;;  %v977_v53 = vadd.f32 %v976_v42, %v2847_v47  ;;  %v1023_v14 = vmul.f32 %v2847_v47, %v2847_v47  ;;  %v2852_v18 = vpop.f32.mrb[7].mxu0 }
 0x25b   : > { %v1071_v54 = vadd.f32 %v1070_v12, %v1022_v46  ;;  %v998_v19 = vadd.f32 %v997_v45, %v2852_v18  ;;  %v1024_v20 = vmul.f32 %v2852_v18, %v2852_v18 }
 0x25c   : > { %v1051_v55 = vadd.f32 %v1050_v52, %v1023_v14 }
 0x25d   : > { %v1072_v56 = vadd.f32 %v1071_v54, %v1024_v20 }
 0x25f   : > { %v2857_v57 = vpop.f32.mrb[8].mxu0 }
 0x260   : > { %v978_v62 = vadd.f32 %v977_v53, %v2857_v57  ;;  %v1025_v63 = vmul.f32 %v2857_v57, %v2857_v57  ;;  %v2862_v3 = vpop.f32.mrb[9].mxu0 }
 0x261   : > { %v999_v4 = vadd.f32 %v998_v19, %v2862_v3  ;;  %v1026_v28 = vmul.f32 %v2862_v3, %v2862_v3  ;;  %v2867_v29 = vpop.f32.mrb[10].mxu0 }
 0x262   : > { %v1052_v6 = vadd.f32 %v1051_v55, %v1025_v63  ;;  %v979_v30 = vadd.f32 %v978_v62, %v2867_v29  ;;  %v1027_v31 = vmul.f32 %v2867_v29, %v2867_v29  ;;  %v2872_v9 = vpop.f32.mrb[11].mxu0 }
 0x263   : > { %v1073_v17 = vadd.f32 %v1072_v56, %v1026_v28  ;;  %v1000_v21 = vadd.f32 %v999_v4, %v2872_v9  ;;  %v1028_v22 = vmul.f32 %v2872_v9, %v2872_v9 }
 0x264   : > { %v1053_v23 = vadd.f32 %v1052_v6, %v1027_v31 }
 0x265   : > { %v1074_v24 = vadd.f32 %v1073_v17, %v1028_v22 }
 0x267   : > { %v2877_v38 = vpop.f32.mrb[12].mxu0 }
 0x268   : > { %v980_v39 = vadd.f32 %v979_v30, %v2877_v38  ;;  %v1029_v25 = vmul.f32 %v2877_v38, %v2877_v38  ;;  %v2882_v40 = vpop.f32.mrb[13].mxu0 }
 0x269   : > { %v1001_v26 = vadd.f32 %v1000_v21, %v2882_v40  ;;  %v1030_v41 = vmul.f32 %v2882_v40, %v2882_v40  ;;  %v2887_v27 = vpop.f32.mrb[14].mxu0 }
 0x26a   : > { %v1054_v32 = vadd.f32 %v1053_v23, %v1029_v25  ;;  %v981_v48 = vadd.f32 %v980_v39, %v2887_v27  ;;  %v1031_v49 = vmul.f32 %v2887_v27, %v2887_v27  ;;  %v2892_v0 = vpop.f32.mrb[15].mxu0 }
 0x26b   : > { %v1075_v33 = vadd.f32 %v1074_v24, %v1030_v41  ;;  %v1002_v1 = vadd.f32 %v1001_v26, %v2892_v0  ;;  %v1032_v50 = vmul.f32 %v2892_v0, %v2892_v0 }
 0x26c   : > { %v1055_v51 = vadd.f32 %v1054_v32, %v1031_v49 }
 0x26d   : > { %v1076_v34 = vadd.f32 %v1075_v33, %v1032_v50 }
 0x26f   : > { %v2897_v58 = vpop.f32.mrb[16].mxu0 }
 0x270   : > { %v982_v59 = vadd.f32 %v981_v48, %v2897_v58  ;;  %v1033_v35 = vmul.f32 %v2897_v58, %v2897_v58  ;;  %v2902_v36 = vpop.f32.mrb[17].mxu0 }
 0x271   : > { %v1003_v11 = vadd.f32 %v1002_v1, %v2902_v36  ;;  %v1034_v15 = vmul.f32 %v2902_v36, %v2902_v36  ;;  %v2907_v16 = vpop.f32.mrb[18].mxu0 }
 0x272   : > { %v1056_v37 = vadd.f32 %v1055_v51, %v1033_v35  ;;  %v983_v7 = vadd.f32 %v982_v59, %v2907_v16  ;;  %v1035_v8 = vmul.f32 %v2907_v16, %v2907_v16  ;;  %v2912_v5 = vpop.f32.mrb[19].mxu0 }
 0x273   : > { %v1077_v12 = vadd.f32 %v1076_v34, %v1034_v15  ;;  %v1004_v42 = vadd.f32 %v1003_v11, %v2912_v5  ;;  %v1036_v43 = vmul.f32 %v2912_v5, %v2912_v5 }
 0x274   : > { %v1057_v45 = vadd.f32 %v1056_v37, %v1035_v8 }
 0x275   : > { %v1078_v46 = vadd.f32 %v1077_v12, %v1036_v43 }
 0x277   : > { %v2917_v52 = vpop.f32.mrb[20].mxu0 }
 0x278   : > { %v984_v53 = vadd.f32 %v983_v7, %v2917_v52  ;;  %v1037_v14 = vmul.f32 %v2917_v52, %v2917_v52  ;;  %v2922_v54 = vpop.f32.mrb[21].mxu0 }
 0x279   : > { %v1005_v19 = vadd.f32 %v1004_v42, %v2922_v54  ;;  %v1038_v20 = vmul.f32 %v2922_v54, %v2922_v54  ;;  %v2927_v55 = vpop.f32.mrb[22].mxu0 }
 0x27a   : > { %v1058_v56 = vadd.f32 %v1057_v45, %v1037_v14  ;;  %v985_v62 = vadd.f32 %v984_v53, %v2927_v55  ;;  %v1039_v63 = vmul.f32 %v2927_v55, %v2927_v55  ;;  %v2932_v4 = vpop.f32.mrb[23].mxu0 }
 0x27b   : > { %v1079_v28 = vadd.f32 %v1078_v46, %v1038_v20  ;;  %v1006_v6 = vadd.f32 %v1005_v19, %v2932_v4  ;;  %v1040_v30 = vmul.f32 %v2932_v4, %v2932_v4 }
 0x27c   : > { %v1059_v31 = vadd.f32 %v1058_v56, %v1039_v63 }
 0x27d   : > { %v1080_v17 = vadd.f32 %v1079_v28, %v1040_v30 }
 0x27f   : > { %v2937_v21 = vpop.f32.mrb[24].mxu0 }
 0x280   : > { %v986_v22 = vadd.f32 %v985_v62, %v2937_v21  ;;  %v1041_v23 = vmul.f32 %v2937_v21, %v2937_v21  ;;  %v2942_v24 = vpop.f32.mrb[25].mxu0 }
 0x281   : > { %v1007_v39 = vadd.f32 %v1006_v6, %v2942_v24  ;;  %v1042_v25 = vmul.f32 %v2942_v24, %v2942_v24  ;;  %v2947_v26 = vpop.f32.mrb[26].mxu0 }
 0x282   : > { %v1060_v41 = vadd.f32 %v1059_v31, %v1041_v23  ;;  %v987_v32 = vadd.f32 %v986_v22, %v2947_v26  ;;  %v1043_v48 = vmul.f32 %v2947_v26, %v2947_v26  ;;  %v2952_v49 = vpop.f32.mrb[27].mxu0 }
 0x283   : > { %v1081_v33 = vadd.f32 %v1080_v17, %v1042_v25  ;;  %v1008_v1 = vadd.f32 %v1007_v39, %v2952_v49  ;;  %v1044_v50 = vmul.f32 %v2952_v49, %v2952_v49 }
 0x284   : > { %v1061_v51 = vadd.f32 %v1060_v41, %v1043_v48 }
 0x285   : > { %v1082_v34 = vadd.f32 %v1081_v33, %v1044_v50 }
 0x287   : > { %v2957_v59 = vpop.f32.mrb[28].mxu0 }
 0x288   : > { %v988_v35 = vadd.f32 %v987_v32, %v2957_v59  ;;  %v1045_v11 = vmul.f32 %v2957_v59, %v2957_v59  ;;  %v2962_v15 = vpop.f32.mrb[29].mxu0 }
 0x289   : > { %v1009_v37 = vadd.f32 %v1008_v1, %v2962_v15  ;;  %v1046_v7 = vmul.f32 %v2962_v15, %v2962_v15  ;;  %v2967_v8 = vpop.f32.mrb[30].mxu0 }
 0x28a   : > { %v1062_v12 = vadd.f32 %v1061_v51, %v1045_v11  ;;  %v989_v42 = vadd.f32 %v988_v35, %v2967_v8  ;;  %v1047_v43 = vmul.f32 %v2967_v8, %v2967_v8  ;;  %v2972_v45 = vpop.f32.mrb[31].mxu0 }
 0x28b   : > { %v1083_v46 = vadd.f32 %v1082_v34, %v1046_v7  ;;  %v1010_v53 = vadd.f32 %v1009_v37, %v2972_v45  ;;  %v1048_v14 = vmul.f32 %v2972_v45, %v2972_v45 }
 0x28c   : > { %v990_v19 = vrot.slane %v989_v42, 4  ;;  %v1063_v20 = vadd.f32 %v1062_v12, %v1047_v43 }
 0x28d   : > { %v1011_v56 = vrot.slane %v1010_v53, 4  ;;  %v1084_v62 = vadd.f32 %v1083_v46, %v1048_v14 }
 0x28e   : > { %v991_v63 = vadd.f32 %v990_v19, %v989_v42  ;;  %v1064_v28 = vrot.slane %v1063_v20, 4 }
 0x28f   : > { %v1012_v6 = vadd.f32 %v1011_v56, %v1010_v53  ;;  %v1085_v30 = vrot.slane %v1084_v62, 4 }
 0x290   : > { %v992_v31 = vrot.slane %v991_v63, 2  ;;  %v1065_v17 = vadd.f32 %v1064_v28, %v1063_v20 }
 0x291   : > { %v1013_v22 = vrot.slane %v1012_v6, 2  ;;  %v1086_v23 = vadd.f32 %v1085_v30, %v1084_v62 }
 0x292   : > { %v993_v39 = vadd.f32 %v992_v31, %v991_v63  ;;  %v1066_v25 = vrot.slane %v1065_v17, 2  ;;  %v1112_v31 = vlaneseq }
 0x293   : > { %v1014_v41 = vadd.f32 %v1013_v22, %v1012_v6  ;;  %v1087_v32 = vrot.slane %v1086_v23, 2  ;;  %v2364_v6 = vmov 1966171168  }
 0x294   : > { %v994_v48 = vrot.slane %v993_v39, 1  ;;  %v1067_v33 = vadd.f32 %v1066_v25, %v1065_v17  ;;  %v1110_v30 = vunpack.c.l.s4 %v2364_v6  ;;  %v1113_v22 = vshrl.u32 %v1112_v31, 7 }
 0x295   : > { %v1015_v1 = vrot.slane %v1014_v41, 1  ;;  %v1088_v50 = vadd.f32 %v1087_v32, %v1086_v23 }
 0x296   : > { %v995_v51 = vadd.f32 %v994_v48, %v993_v39  ;;  %v1068_v34 = vrot.slane %v1067_v33, 1  ;;  %v1111_v17 = vunpack.c.0.s8 %v1110_v30  ;;  %v1101_v48 = vld [vmem:[%s411_s17] sm:$0x3] }
 0x297   : > { %v1016_v35 = vadd.f32 %v1015_v1, %v1014_v41  ;;  %v1089_v11 = vrot.slane %v1088_v50, 1  ;;  %v2982_v1 = vsub.s32 0, %v1113_v22 }
 0x298   : > { %v1069_v37 = vadd.f32 %v1068_v34, %v1067_v33  ;;  %v1091_v7 = vmul.f32 0.0078125, %v995_v51  ;;  %v1114_v39 = vsub.s32 %v1111_v17, %v1113_v22 }
 0x299   : > { %v1090_v12 = vadd.f32 %v1089_v11, %v1088_v50  ;;  %v1092_v42 = vmul.f32 0.0078125, %v1016_v35  ;;  %v1133_v50 = vsub.s32 1, %v1113_v22 }
 0x29a   : > { %v1093_v43 = vmul.f32 0.0078125, %v1069_v37  ;;  %v1095_v46 = vmul.f32 %v1091_v7, %v1091_v7 }
 0x29b   : > { %v1094_v53 = vmul.f32 0.0078125, %v1090_v12  ;;  %v1096_v14 = vmul.f32 %v1092_v42, %v1092_v42 }
 0x29c   : > { %v1097_v19 = vsub.f32 %v1093_v43, %v1095_v46 }
 0x29d   : > { %v1098_v20 = vsub.f32 %v1094_v53, %v1096_v14 }
 0x29e   : > { %v1099_v56 = vmax.f32 %v1097_v19, 0.0 }
 0x29f   : > { %v1100_v62 = vmax.f32 %v1098_v20, 0.0 }
 0x2a0   : > { %v1102_v63 = vadd.f32 1e-05, %v1099_v56 }
 0x2a1   : > { %v1103_v28 = vadd.f32 1e-05, %v1100_v62 }
 0x2a2   : > { %2174 = vrsqrt.f32 %v1102_v63 }
 0x2a3   : > { %2176 = vrsqrt.f32 %v1103_v28 }
 0x2ac   : > { %v2175_v23 = vpop.eup %2174 }
 0x2ad   : > { %v2177_v25 = vpop.eup %2176 }
 0x2ae   : > { %v1108_v41 = vcombine.low %v2175_v23, %v2177_v25 }
 0x2b0   : > { %v1115_v32 = vrot.slane %v1108_v41, %v1114_v39 }
 0x2b2   : > { %v1122_v33 = vrot.slane %v1115_v32, %v1114_v39 }
 0x2b4   : > { %v1124_v51 = vmul.f32 %v1122_v33, %v1101_v48 }
 0x2b6   : > { %v1130_v34 = vrot.slane %v1124_v51, %v2982_v1  ;;  %v1134_v35 = vrot.slane %v1124_v51, %v1133_v50 }
 0x2b8   : > { %v1137_v11 = vmul.f32 %v1130_v34, %v1091_v7  ;;  %v1138_v37 = vmul.f32 %v1134_v35, %v1092_v42  ;;  %v1189_v12 = vmul.f32 %v1134_v35, %v2972_v45  ;;  %v1159_v43 = vmul.f32 %v1134_v35, %v2819_v61 }
 0x2b9   : > { %v1161_v46 = vmul.f32 %v1134_v35, %v2829_v2  ;;  %v1158_v53 = vmul.f32 %v1130_v34, %v2817_v60  ;;  %v1160_v14 = vmul.f32 %v1130_v34, %v2821_v10  ;;  %v1163_v19 = vmul.f32 %v1134_v35, %v2842_v44 }
 0x2ba   : > { %v1141_v20 = vcombine.low %v1137_v11, %v1138_v37  ;;  %v1165_v56 = vmul.f32 %v1134_v35, %v2852_v18  ;;  %v1162_v62 = vmul.f32 %v1130_v34, %v2837_v13  ;;  %v1164_v7 = vmul.f32 %v1130_v34, %v2847_v47  ;;  %v1125_v13 = vld [vmem:[%s416_s24] sm:$0x3] }
 0x2bb   : > { %v1167_v45 = vmul.f32 %v1134_v35, %v2862_v3  ;;  %v1169_v61 = vmul.f32 %v1134_v35, %v2872_v9  ;;  %v1166_v2 = vmul.f32 %v1130_v34, %v2857_v57  ;;  %v1168_v42 = vmul.f32 %v1130_v34, %v2867_v29 }
 0x2bc   : > { %v1148_v60 = vrot.slane %v1141_v20, %v1114_v39  ;;  %v1171_v10 = vmul.f32 %v1134_v35, %v2882_v40  ;;  %v1173_v44 = vmul.f32 %v1134_v35, %v2892_v0  ;;  %v1170_v63 = vmul.f32 %v1130_v34, %v2877_v38 }
 0x2bd   : > { %v1172_v47 = vmul.f32 %v1130_v34, %v2887_v27  ;;  %v1175_v18 = vmul.f32 %v1134_v35, %v2902_v36  ;;  %v1177_v57 = vmul.f32 %v1134_v35, %v2912_v5  ;;  %v1174_v3 = vmul.f32 %v1130_v34, %v2897_v58 }
 0x2be   : > { %v1155_v29 = vrot.slane %v1148_v60, %v1114_v39  ;;  %v1176_v9 = vmul.f32 %v1130_v34, %v2907_v16  ;;  %v3012_v40 = vmul.f32 %v1134_v35, %v2922_v54  ;;  %v3015_v38 = vmul.f32 %v1134_v35, %v2932_v4 }
 0x2bf   : > { %v3018_v0 = vmul.f32 %v1130_v34, %v2917_v52  ;;  %v3021_v27 = vmul.f32 %v1130_v34, %v2927_v55  ;;  %v3024_v36 = vmul.f32 %v1134_v35, %v2942_v24  ;;  %v3027_v58 = vmul.f32 %v1134_v35, %v2952_v49 }
 0x2c0   : > { %v1157_v5 = vsub.f32 %v1125_v13, %v1155_v29  ;;  %v3030_v16 = vmul.f32 %v1130_v34, %v2937_v21  ;;  %v3033_v54 = vmul.f32 %v1130_v34, %v2947_v26  ;;  %v3036_v4 = vmul.f32 %v1134_v35, %v2962_v15 }
 0x2c1   : > { %v3039_v52 = vmul.f32 %v1130_v34, %v2957_v59  ;;  %v3042_v55 = vmul.f32 %v1130_v34, %v2967_v8 }
 0x2c2   : > { %v3045_v24 = vrot.slane %v1157_v5, %v2982_v1  ;;  %v3047_v49 = vrot.slane %v1157_v5, %v1133_v50 }
 0x2c4   : > { %v3050_v21 = vadd.f32 %v3047_v49, %v1189_v12  ;;  %v1202_v26 = vadd.f32 %v3047_v49, %v1159_v43  ;;  %v1204_v28 = vadd.f32 %v3047_v49, %v1161_v46  ;;  %v1201_v15 = vadd.f32 %v3045_v24, %v1158_v53 }
 0x2c5   : > { %v1203_v59 = vadd.f32 %v3045_v24, %v1160_v14  ;;  %v1206_v6 = vadd.f32 %v3047_v49, %v1163_v19  ;;  %v1208_v8 = vadd.f32 %v3047_v49, %v1165_v56  ;;  %v1205_v30 = vadd.f32 %v3045_v24, %v1162_v62 }
 0x2c6   : > { %v1264_v31 = vmax.f32 %v3050_v21, 0.0  ;;  %v1234_v17 = vmax.f32 %v1202_v26, 0.0  ;;  %v1236_v22 = vmax.f32 %v1204_v28, 0.0  ;;  %v1233_v23 = vmax.f32 %v1201_v15, 0.0  ;;  %v1266_v21 = vld [vmem:[#allocation3 + $0x8] sm:$0xff] }
 0x2c7   : > { %v1235_v39 = vmax.f32 %v1203_v59, 0.0  ;;  %v1238_v25 = vmax.f32 %v1206_v6, 0.0  ;;  %v1240_v41 = vmax.f32 %v1208_v8, 0.0  ;;  %v1207_v32 = vadd.f32 %v3045_v24, %v1164_v7 }
 0x2c8   : > { %v1282_v48 = vpack.c.bf16 %v1236_v22, %v1234_v17  ;;  %v1237_v33 = vmax.f32 %v1205_v30, 0.0  ;;  %v1210_v50 = vadd.f32 %v3047_v49, %v1167_v45  ;;  %v1212_v51 = vadd.f32 %v3047_v49, %v1169_v61 }
 0x2c9   : > { %v1281_v34 = vpack.c.bf16 %v1235_v39, %v1233_v23  ;;  %v1284_v35 = vpack.c.bf16 %v1240_v41, %v1238_v25  ;;  %v1239_v11 = vmax.f32 %v1207_v32, 0.0  ;;  %v1209_v37 = vadd.f32 %v3045_v24, %v1166_v2 }
 0x2ca   : > { %1457 = vmatprep.mubr.bf16.mxu1 %v1282_v48  ;;  %v1242_v12 = vmax.f32 %v1210_v50, 0.0  ;;  %v1244_v43 = vmax.f32 %v1212_v51, 0.0  ;;  %v1211_v46 = vadd.f32 %v3045_v24, %v1168_v42  ;;  %v1214_v53 = vadd.f32 %v3047_v49, %v1171_v10 }
 0x2cb   : > { %1458 = vmatmul.mubr.bf16.vlgmr.msra.gmra.mrb[0].mxu1 %v1281_v34  ;;  %v1283_v14 = vpack.c.bf16 %v1239_v11, %v1237_v33  ;;  %v1241_v19 = vmax.f32 %v1209_v37, 0.0  ;;  %v1216_v20 = vadd.f32 %v3047_v49, %v1173_v44  ;;  %v1213_v56 = vadd.f32 %v3045_v24, %v1170_v63 }
 0x2cc   : > { %1465 = vmatprep.mubr.bf16.mxu1 %v1284_v35  ;;  %v1286_v62 = vpack.c.bf16 %v1244_v43, %v1242_v12  ;;  %v1243_v7 = vmax.f32 %v1211_v46, 0.0  ;;  %v1246_v45 = vmax.f32 %v1214_v53, 0.0  ;;  %v1215_v61 = vadd.f32 %v3045_v24, %v1172_v47 }
 0x2cd   : > { %v1248_v2 = vmax.f32 %v1216_v20, 0.0  ;;  %v1245_v60 = vmax.f32 %v1213_v56, 0.0  ;;  %v1218_v13 = vadd.f32 %v3047_v49, %v1175_v18  ;;  %v1220_v42 = vadd.f32 %v3047_v49, %v1177_v57 }
 0x2ce   : > { %v1285_v10 = vpack.c.bf16 %v1243_v7, %v1241_v19  ;;  %v1247_v29 = vmax.f32 %v1215_v61, 0.0  ;;  %v1217_v5 = vadd.f32 %v3045_v24, %v1174_v3  ;;  %v1219_v44 = vadd.f32 %v3045_v24, %v1176_v9 }
 0x2cf   : > { %v1288_v26 = vpack.c.bf16 %v1248_v2, %v1246_v45  ;;  %v1250_v63 = vmax.f32 %v1218_v13, 0.0  ;;  %v1252_v28 = vmax.f32 %v1220_v42, 0.0  ;;  %v1222_v15 = vadd.f32 %v3047_v49, %v3012_v40  ;;  %v1269_v13 = vld [vmem:[#allocation3 + $0x20] sm:$0xff] }
 0x2d0   : > { %v1287_v59 = vpack.c.bf16 %v1247_v29, %v1245_v60  ;;  %v1249_v47 = vmax.f32 %v1217_v5, 0.0  ;;  %v1251_v6 = vmax.f32 %v1219_v44, 0.0  ;;  %v1224_v18 = vadd.f32 %v3047_v49, %v3015_v38  ;;  %v1270_v5 = vld [vmem:[#allocation3 + $0x28] sm:$0xff] }
 0x2d1   : > { %v1290_v8 = vpack.c.bf16 %v1252_v28, %v1250_v63  ;;  %v1254_v57 = vmax.f32 %v1222_v15, 0.0  ;;  %v1221_v30 = vadd.f32 %v3045_v24, %v3018_v0  ;;  %v1223_v3 = vadd.f32 %v3045_v24, %v3021_v27 }
 0x2d2   : > { %v1289_v9 = vpack.c.bf16 %v1251_v6, %v1249_v47  ;;  %v1256_v17 = vmax.f32 %v1224_v18, 0.0  ;;  %v1226_v22 = vadd.f32 %v3047_v49, %v3024_v36  ;;  %v1228_v40 = vadd.f32 %v3047_v49, %v3027_v58 }
 0x2d3   : > { %1466 = vmatmul.mubr.bf16.gmra.mrb[4].mxu1 %v1283_v14  ;;  %v1253_v23 = vmax.f32 %v1221_v30, 0.0  ;;  %v1255_v39 = vmax.f32 %v1223_v3, 0.0  ;;  %v1225_v38 = vadd.f32 %v3045_v24, %v3030_v16  ;;  %v1227_v0 = vadd.f32 %v3045_v24, %v3033_v54  ;;  %v1267_v14 = vld [vmem:[#allocation3 + $0x10] sm:$0xff] }
 0x2d4   : > { %1473 = vmatprep.mubr.bf16.mxu1 %v1286_v62  ;;  %v1292_v25 = vpack.c.bf16 %v1256_v17, %v1254_v57  ;;  %v1258_v27 = vmax.f32 %v1226_v22, 0.0  ;;  %v1260_v41 = vmax.f32 %v1228_v40, 0.0  ;;  %v1230_v32 = vadd.f32 %v3047_v49, %v3036_v4  ;;  %v1268_v62 = vld [vmem:[#allocation3 + $0x18] sm:$0xff]  ;;  %v1273_v22 = vld [vmem:[#allocation3 + $0x40] sm:$0xff] }
 0x2d5   : > { %v1291_v36 = vpack.c.bf16 %v1255_v39, %v1253_v23  ;;  %v1257_v48 = vmax.f32 %v1225_v38, 0.0  ;;  %v1259_v33 = vmax.f32 %v1227_v0, 0.0  ;;  %v1229_v58 = vadd.f32 %v3045_v24, %v3039_v52  ;;  %v1265_v52 = vld [vmem:[#allocation3] sm:$0xff]  ;;  %v1274_v38 = vld [vmem:[#allocation3 + $0x48] sm:$0xff] }
 0x2d6   : > { %v1294_v50 = vpack.c.bf16 %v1260_v41, %v1258_v27  ;;  %v1262_v51 = vmax.f32 %v1230_v32, 0.0  ;;  %v1231_v16 = vadd.f32 %v3045_v24, %v3042_v55 }
 0x2d7   : > { %v1293_v34 = vpack.c.bf16 %v1259_v33, %v1257_v48  ;;  %v1261_v54 = vmax.f32 %v1229_v58, 0.0 }
 0x2d8   : > { %v1296_v35 = vpack.c.bf16 %v1264_v31, %v1262_v51  ;;  %v1263_v11 = vmax.f32 %v1231_v16, 0.0 }
 0x2da   : > { %v1295_v37 = vpack.c.bf16 %v1263_v11, %v1261_v54  ;;  %v1277_v11 = vld [vmem:[#allocation3 + $0x60] sm:$0xff] }
 0x2db   : > { %1474 = vmatmul.mubr.bf16.gmra.mrb[8].mxu1 %v1285_v10 }
 0x2dc   : > { %1481 = vmatprep.mubr.bf16.mxu1 %v1288_v26 }
 0x2e3   : > { %1482 = vmatmul.mubr.bf16.gmra.mrb[12].mxu1 %v1287_v59  ;;  %v1271_v59 = vld [vmem:[#allocation3 + $0x30] sm:$0xff] }
 0x2e4   : > { %1489 = vmatprep.mubr.bf16.mxu1 %v1290_v8  ;;  %v1272_v8 = vld [vmem:[#allocation3 + $0x38] sm:$0xff] }
 0x2eb   : > { %1490 = vmatmul.mubr.bf16.gmra.mrb[16].mxu1 %v1289_v9 }
 0x2ec   : > { %1497 = vmatprep.mubr.bf16.mxu1 %v1292_v25 }
 0x2f3   : > { %1498 = vmatmul.mubr.bf16.gmra.mrb[20].mxu1 %v1291_v36  ;;  %v1275_v36 = vld [vmem:[#allocation3 + $0x50] sm:$0xff] }
 0x2f4   : > { %1505 = vmatprep.mubr.bf16.mxu1 %v1294_v50  ;;  %v1276_v50 = vld [vmem:[#allocation3 + $0x58] sm:$0xff] }
 0x2fb   : > { %1506 = vmatmul.mubr.bf16.gmra.mrb[24].mxu1 %v1293_v34 }
 0x2fc   : > { %1513 = vmatprep.mubr.bf16.mxu1 %v1296_v35 }
 0x303   : > { %1514 = vmatmul.mubr.bf16.gmra.mrb[28].mxu1 %v1295_v37 }
 0x39e   : > { %v1942_v4 = vpop.f32.mrb[0].mxu1 }
 0x39f   : > { %v1943_v55 = vpop.f32.mrb[1].mxu1 }
 0x3a0   : > { %v1944_v24 = vadd.f32 %v1943_v55, %v1942_v4  ;;  %v1945_v49 = vpop.f32.mrb[2].mxu1  ;;  %v1278_v55 = vld [vmem:[#allocation3 + $0x68] sm:$0xff] }
 0x3a1   : > { %v1946_v31 = vpop.f32.mrb[3].mxu1 }
 0x3a2   : > { %v1522_v12 = vadd.f32 %v1944_v24, %v1265_v52  ;;  %v1947_v43 = vadd.f32 %v1946_v31, %v1945_v49 }
 0x3a4   : > { %1538 = vst [vmem:[#allocation3] sm:$0xff] %v1522_v12  ;;  %v1523_v46 = vadd.f32 %v1947_v43, %v1266_v21  ;;  %v1279_v43 = vld [vmem:[#allocation3 + $0x70] sm:$0xff] }
 0x3a6   : > { %1539 = vst [vmem:[#allocation3 + $0x8] sm:$0xff] %v1523_v46  ;;  %v1948_v53 = vpop.f32.mrb[4].mxu1 }
 0x3a7   : > { %v1949_v19 = vpop.f32.mrb[5].mxu1 }
 0x3a8   : > { %v1950_v20 = vadd.f32 %v1949_v19, %v1948_v53  ;;  %v1951_v56 = vpop.f32.mrb[6].mxu1  ;;  %v1280_v19 = vld [vmem:[#allocation3 + $0x78] sm:$0xff] }
 0x3a9   : > { %v1952_v7 = vpop.f32.mrb[7].mxu1 }
 0x3aa   : > { %v1524_v45 = vadd.f32 %v1950_v20, %v1267_v14  ;;  %v1953_v61 = vadd.f32 %v1952_v7, %v1951_v56 }
 0x3ac   : > { %1540 = vst [vmem:[#allocation3 + $0x10] sm:$0xff] %v1524_v45  ;;  %v1525_v2 = vadd.f32 %v1953_v61, %v1268_v62  ;;  %v3098_v45 = vld [vmem:[#allocation3] sm:$0xff] (!%p1919_p5) }
 0x3ad   : > { %v3100_v61 = vld [vmem:[#allocation3 + $0x8] sm:$0xff] (!%p1919_p5) }
 0x3ae   : > { %1541 = vst [vmem:[#allocation3 + $0x18] sm:$0xff] %v1525_v2  ;;  %v1954_v60 = vpop.f32.mrb[8].mxu1 }
 0x3af   : > { %v1955_v42 = vpop.f32.mrb[9].mxu1 }
 0x3b0   : > { %v1956_v10 = vadd.f32 %v1955_v42, %v1954_v60  ;;  %v1957_v29 = vpop.f32.mrb[10].mxu1  ;;  %v1595_v42 = vmul.f32 (!%p1919_p5), %v3098_v45, %v3098_v45 }
 0x3b1   : > { %v1958_v44 = vpop.f32.mrb[11].mxu1 }
 0x3b2   : > { %v1526_v26 = vadd.f32 %v1956_v10, %v1269_v13  ;;  %v1959_v63 = vadd.f32 %v1958_v44, %v1957_v29  ;;  %v1574_v13 = vadd.f32 (!%p1919_p5), %v3100_v61, %v3098_v45  ;;  %v1596_v10 = vmul.f32 (!%p1919_p5), %v3100_v61, %v3100_v61 }
 0x3b3   : > { %v3102_v2 = vld [vmem:[#allocation3 + $0x10] sm:$0xff] (!%p1919_p5) }
 0x3b4   : > { %1542 = vst [vmem:[#allocation3 + $0x20] sm:$0xff] %v1526_v26  ;;  %v1527_v28 = vadd.f32 %v1959_v63, %v1270_v5  ;;  %v1597_v29 = vmul.f32 (!%p1919_p5), %v3102_v2, %v3102_v2  ;;  %v1575_v44 = vadd.f32 (!%p1919_p5), %v1574_v13, %v3102_v2  ;;  %v1611_v63 = vadd.f32 (!%p1919_p5), %v1596_v10, %v1595_v42 }
 0x3b5   : > { %v3104_v60 = vld [vmem:[#allocation3 + $0x18] sm:$0xff] (!%p1919_p5) }
 0x3b6   : > { %1543 = vst [vmem:[#allocation3 + $0x28] sm:$0xff] %v1527_v28  ;;  %v1960_v15 = vpop.f32.mrb[12].mxu1  ;;  %v1598_v26 = vmul.f32 (!%p1919_p5), %v3104_v60, %v3104_v60 }
 0x3b7   : > { %v1961_v47 = vpop.f32.mrb[13].mxu1 }
 0x3b8   : > { %v1962_v6 = vadd.f32 %v1961_v47, %v1960_v15  ;;  %v1963_v18 = vpop.f32.mrb[14].mxu1  ;;  %v1576_v15 = vadd.f32 (!%p1919_p5), %v1575_v44, %v3104_v60  ;;  %v1612_v47 = vadd.f32 (!%p1919_p5), %v1611_v63, %v1597_v29 }
 0x3b9   : > { %v1964_v57 = vpop.f32.mrb[15].mxu1 }
 0x3ba   : > { %v1528_v30 = vadd.f32 %v1962_v6, %v1271_v59  ;;  %v1965_v3 = vadd.f32 %v1964_v57, %v1963_v18  ;;  %v1613_v57 = vadd.f32 (!%p1919_p5), %v1612_v47, %v1598_v26 }
 0x3bb   : > { %v3114_v5 = vld [vmem:[#allocation3 + $0x20] sm:$0xff] (!%p1919_p5) }
 0x3bc   : > { %1544 = vst [vmem:[#allocation3 + $0x30] sm:$0xff] %v1528_v30  ;;  %v1529_v9 = vadd.f32 %v1965_v3, %v1272_v8  ;;  %v1599_v59 = vmul.f32 (!%p1919_p5), %v3114_v5, %v3114_v5  ;;  %v1577_v18 = vadd.f32 (!%p1919_p5), %v1576_v15, %v3114_v5 }
 0x3bd   : > { %v3119_v28 = vld [vmem:[#allocation3 + $0x28] sm:$0xff] (!%p1919_p5) }
 0x3be   : > { %1545 = vst [vmem:[#allocation3 + $0x38] sm:$0xff] %v1529_v9  ;;  %v1966_v17 = vpop.f32.mrb[16].mxu1  ;;  %v1600_v8 = vmul.f32 (!%p1919_p5), %v3119_v28, %v3119_v28  ;;  %v1578_v3 = vadd.f32 (!%p1919_p5), %v1577_v18, %v3119_v28 }
 0x3bf   : > { %v1967_v40 = vpop.f32.mrb[17].mxu1 }
 0x3c0   : > { %v1968_v23 = vadd.f32 %v1967_v40, %v1966_v17  ;;  %v1969_v39 = vpop.f32.mrb[18].mxu1  ;;  %v1614_v17 = vadd.f32 (!%p1919_p5), %v1613_v57, %v1599_v59 }
 0x3c1   : > { %v1970_v0 = vpop.f32.mrb[19].mxu1 }
 0x3c2   : > { %v1530_v25 = vadd.f32 %v1968_v23, %v1273_v22  ;;  %v1971_v27 = vadd.f32 %v1970_v0, %v1969_v39  ;;  %v1615_v39 = vadd.f32 (!%p1919_p5), %v1614_v17, %v1600_v8 }
 0x3c3   : > { %v3124_v6 = vld [vmem:[#allocation3 + $0x30] sm:$0xff] (!%p1919_p5) }
 0x3c4   : > { %1546 = vst [vmem:[#allocation3 + $0x40] sm:$0xff] %v1530_v25  ;;  %v1531_v41 = vadd.f32 %v1971_v27, %v1274_v38  ;;  %v1601_v9 = vmul.f32 (!%p1919_p5), %v3124_v6, %v3124_v6  ;;  %v1579_v40 = vadd.f32 (!%p1919_p5), %v1578_v3, %v3124_v6 }
 0x3c5   : > { %v3129_v30 = vld [vmem:[#allocation3 + $0x38] sm:$0xff] (!%p1919_p5) }
 0x3c6   : > { %1547 = vst [vmem:[#allocation3 + $0x48] sm:$0xff] %v1531_v41  ;;  %v1972_v32 = vpop.f32.mrb[20].mxu1  ;;  %v1602_v23 = vmul.f32 (!%p1919_p5), %v3129_v30, %v3129_v30  ;;  %v1580_v0 = vadd.f32 (!%p1919_p5), %v1579_v40, %v3129_v30  ;;  %v1616_v27 = vadd.f32 (!%p1919_p5), %v1615_v39, %v1601_v9 }
 0x3c7   : > { %v1973_v48 = vpop.f32.mrb[21].mxu1 }
 0x3c8   : > { %v1974_v33 = vadd.f32 %v1973_v48, %v1972_v32  ;;  %v1975_v58 = vpop.f32.mrb[22].mxu1  ;;  %v1617_v48 = vadd.f32 (!%p1919_p5), %v1616_v27, %v1602_v23  ;;  %v1637_v23 = vld [vmem:[%s3236_s5] sm:$0x1] (!%p1919_p5) }
 0x3c9   : > { %v1976_v51 = vpop.f32.mrb[23].mxu1 }
 0x3ca   : > { %v1532_v16 = vadd.f32 %v1974_v33, %v1275_v36  ;;  %v1977_v34 = vadd.f32 %v1976_v51, %v1975_v58 }
 0x3cb   : > { %v3134_v22 = vld [vmem:[#allocation3 + $0x40] sm:$0xff] (!%p1919_p5) }
 0x3cc   : > { %1548 = vst [vmem:[#allocation3 + $0x50] sm:$0xff] %v1532_v16  ;;  %v1533_v54 = vadd.f32 %v1977_v34, %v1276_v50  ;;  %v1603_v25 = vmul.f32 (!%p1919_p5), %v3134_v22, %v3134_v22  ;;  %v1581_v32 = vadd.f32 (!%p1919_p5), %v1580_v0, %v3134_v22 }
 0x3cd   : > { %v3139_v38 = vld [vmem:[#allocation3 + $0x48] sm:$0xff] (!%p1919_p5) }
 0x3ce   : > { %1549 = vst [vmem:[#allocation3 + $0x58] sm:$0xff] %v1533_v54  ;;  %v1978_v35 = vpop.f32.mrb[24].mxu1  ;;  %v1604_v36 = vmul.f32 (!%p1919_p5), %v3139_v38, %v3139_v38  ;;  %v1582_v58 = vadd.f32 (!%p1919_p5), %v1581_v32, %v3139_v38  ;;  %v1618_v51 = vadd.f32 (!%p1919_p5), %v1617_v48, %v1603_v25  ;;  %v1641_v25 = vld [vmem:[%s3237_s6] sm:$0x1] (!%p1919_p5) }
 0x3cf   : > { %v1979_v37 = vpop.f32.mrb[25].mxu1 }
 0x3d0   : > { %v1980_v4 = vadd.f32 %v1979_v37, %v1978_v35  ;;  %v1981_v52 = vpop.f32.mrb[26].mxu1  ;;  %v1619_v35 = vadd.f32 (!%p1919_p5), %v1618_v51, %v1604_v36 }
 0x3d1   : > { %v1982_v24 = vpop.f32.mrb[27].mxu1 }
 0x3d2   : > { %v1534_v49 = vadd.f32 %v1980_v4, %v1277_v11  ;;  %v1983_v21 = vadd.f32 %v1982_v24, %v1981_v52 }
 0x3d3   : > { %v3144_v41 = vld [vmem:[#allocation3 + $0x50] sm:$0xff] (!%p1919_p5) }
 0x3d4   : > { %1550 = vst [vmem:[#allocation3 + $0x60] sm:$0xff] %v1534_v49  ;;  %v1535_v31 = vadd.f32 %v1983_v21, %v1278_v55  ;;  %v1605_v50 = vmul.f32 (!%p1919_p5), %v3144_v41, %v3144_v41  ;;  %v1583_v34 = vadd.f32 (!%p1919_p5), %v1582_v58, %v3144_v41 }
 0x3d5   : > { %v3149_v33 = vld [vmem:[#allocation3 + $0x58] sm:$0xff] (!%p1919_p5) }
 0x3d6   : > { %1551 = vst [vmem:[#allocation3 + $0x68] sm:$0xff] %v1535_v31  ;;  %v1984_v12 = vpop.f32.mrb[28].mxu1  ;;  %v1606_v54 = vmul.f32 (!%p1919_p5), %v3149_v33, %v3149_v33  ;;  %v1584_v37 = vadd.f32 (!%p1919_p5), %v1583_v34, %v3149_v33  ;;  %v1620_v52 = vadd.f32 (!%p1919_p5), %v1619_v35, %v1605_v50 }
 0x3d7   : > { %v1985_v46 = vpop.f32.mrb[29].mxu1 }
 0x3d8   : > { %v1986_v53 = vadd.f32 %v1985_v46, %v1984_v12  ;;  %v1987_v14 = vpop.f32.mrb[30].mxu1  ;;  %1557 = sbr.rel (%p1919_p5) target bundleno = 1051 (0x41b), region = 68  ;;  %v1621_v21 = vadd.f32 (!%p1919_p5), %v1620_v52, %v1606_v54 }
 0x3d9   : > { %v1988_v20 = vpop.f32.mrb[31].mxu1 }
 0x3da   : > { %v1536_v56 = vadd.f32 %v1986_v53, %v1279_v43  ;;  %v1989_v62 = vadd.f32 %v1988_v20, %v1987_v14 }
 0x3db   : > { %v1570_v16 = vld [vmem:[#allocation3 + $0x60] sm:$0xff] (!%p1919_p5) }
 0x3dc   : > { %1552 = vst [vmem:[#allocation3 + $0x70] sm:$0xff] %v1536_v56  ;;  %v1537_v7 = vadd.f32 %v1989_v62, %v1280_v19  ;;  %v1607_v4 = vmul.f32 (!%p1919_p5), %v1570_v16, %v1570_v16  ;;  %v1585_v24 = vadd.f32 (!%p1919_p5), %v1584_v37, %v1570_v16 }
 0x3dd   : > { %v1571_v11 = vld [vmem:[#allocation3 + $0x68] sm:$0xff] (!%p1919_p5) }
 0x3de   : > { %1553 = vst [vmem:[#allocation3 + $0x78] sm:$0xff] %v1537_v7  ;;  %v1608_v49 = vmul.f32 (!%p1919_p5), %v1571_v11, %v1571_v11  ;;  %v1586_v12 = vadd.f32 (!%p1919_p5), %v1585_v24, %v1571_v11  ;;  %v1622_v46 = vadd.f32 (!%p1919_p5), %v1621_v21, %v1607_v4 }
 0x3e0   : > { %v1623_v19 = vadd.f32 %v1622_v46, %v1608_v49 }
 0x3e3   : > { %v3158_v55 = vld [vmem:[#allocation3 + $0x70] sm:$0xff] }
 0x3e4   : > { %v1609_v43 = vmul.f32 %v3158_v55, %v3158_v55  ;;  %v1587_v53 = vadd.f32 %v1586_v12, %v3158_v55 }
 0x3e5   : > { %v3160_v31 = vld [vmem:[#allocation3 + $0x78] sm:$0xff] }
 0x3e6   : > { %v1610_v14 = vmul.f32 %v3160_v31, %v3160_v31  ;;  %v1588_v20 = vadd.f32 %v1587_v53, %v3160_v31  ;;  %v1624_v56 = vadd.f32 %v1623_v19, %v1609_v43 }
 0x3e8   : > { %v1589_v62 = vrot.slane %v1588_v20, 4  ;;  %v1625_v7 = vadd.f32 %v1624_v56, %v1610_v14 }
 0x3ea   : > { %v1590_v13 = vadd.f32 %v1589_v62, %v1588_v20  ;;  %v1626_v42 = vrot.slane %v1625_v7, 4 }
 0x3ec   : > { %v1591_v10 = vrot.slane %v1590_v13, 2  ;;  %v1627_v29 = vadd.f32 %v1626_v42, %v1625_v7 }
 0x3ee   : > { %v1592_v44 = vadd.f32 %v1591_v10, %v1590_v13  ;;  %v1628_v26 = vrot.slane %v1627_v29, 2 }
 0x3f0   : > { %v1593_v63 = vrot.slane %v1592_v44, 1  ;;  %v1629_v15 = vadd.f32 %v1628_v26, %v1627_v29 }
 0x3f2   : > { %v1594_v59 = vadd.f32 %v1593_v63, %v1592_v44  ;;  %v1630_v47 = vrot.slane %v1629_v15, 1 }
 0x3f4   : > { %v1632_v18 = vmul.f32 0.0078125, %v1594_v59  ;;  %v1631_v8 = vadd.f32 %v1630_v47, %v1629_v15 }
 0x3f6   : > { %v1634_v57 = vmul.f32 %v1632_v18, %v1632_v18  ;;  %v1633_v3 = vmul.f32 0.0078125, %v1631_v8 }
 0x3f8   : > { %v1635_v9 = vsub.f32 %v1633_v3, %v1634_v57 }
 0x3fa   : > { %v1636_v17 = vmax.f32 %v1635_v9, 0.0 }
 0x3fc   : > { %v1638_v40 = vadd.f32 1e-05, %v1636_v17 }
 0x3fe   : > { %2178 = vrsqrt.f32 %v1638_v40 }
 0x408   : > { %v2179_v39 = vpop.eup %2178 }
 0x409   : > { %v1640_v0 = vmul.f32 %v2179_v39, %v1637_v23 }
 0x40b   : > { %v1642_v27 = vmul.f32 %v1640_v0, %v1632_v18  ;;  %v1648_v32 = vrot.slane %v1640_v0, %v2982_v1 }
 0x40d   : > { %v1643_v36 = vsub.f32 %v1641_v25, %v1642_v27  ;;  %v1650_v48 = vmul.f32 %v1648_v32, %v3098_v45  ;;  %v1651_v58 = vmul.f32 %v1648_v32, %v3100_v61  ;;  %v1652_v50 = vmul.f32 %v1648_v32, %v3102_v2 }
 0x40e   : > { %v1653_v51 = vmul.f32 %v1648_v32, %v3104_v60  ;;  %v1654_v34 = vmul.f32 %v1648_v32, %v3114_v5  ;;  %v1655_v54 = vmul.f32 %v1648_v32, %v3119_v28  ;;  %v1656_v35 = vmul.f32 %v1648_v32, %v3124_v6 }
 0x40f   : > { %v1670_v37 = vrot.slane %v1643_v36, %v2982_v1  ;;  %v1657_v4 = vmul.f32 %v1648_v32, %v3129_v30  ;;  %v1658_v52 = vmul.f32 %v1648_v32, %v3134_v22  ;;  %v1659_v45 = vmul.f32 %v1648_v32, %v3139_v38 }
 0x410   : > { %v1660_v61 = vmul.f32 %v1648_v32, %v3144_v41  ;;  %v1661_v2 = vmul.f32 %v1648_v32, %v3149_v33  ;;  %v1662_v24 = vmul.f32 %v1648_v32, %v1570_v16  ;;  %v1663_v60 = vmul.f32 %v1648_v32, %v1571_v11 }
 0x411   : > { %v1672_v49 = vadd.f32 %v1670_v37, %v1650_v48  ;;  %v1673_v5 = vadd.f32 %v1670_v37, %v1651_v58  ;;  %v1674_v21 = vadd.f32 %v1670_v37, %v1652_v50  ;;  %v1675_v28 = vadd.f32 %v1670_v37, %v1653_v51 }
 0x412   : > { %v1676_v12 = vadd.f32 %v1670_v37, %v1654_v34  ;;  %v1677_v6 = vadd.f32 %v1670_v37, %v1655_v54  ;;  %v1678_v43 = vadd.f32 %v1670_v37, %v1656_v35  ;;  %v1679_v1 = vadd.f32 %v1670_v37, %v1657_v4 }
 0x413   : > { %1688 = vst [vmem:[#allocation10] sm:$0xff] %v1672_v49  ;;  %1689 = vst [vmem:[#allocation10 + $0x8] sm:$0xff] %v1673_v5  ;;  %v1680_v30 = vadd.f32 %v1670_v37, %v1658_v52  ;;  %v1681_v22 = vadd.f32 %v1670_v37, %v1659_v45  ;;  %v1682_v38 = vadd.f32 %v1670_v37, %v1660_v61 }
 0x414   : > { %1690 = vst [vmem:[#allocation10 + $0x10] sm:$0xff] %v1674_v21  ;;  %1691 = vst [vmem:[#allocation10 + $0x18] sm:$0xff] %v1675_v28  ;;  %v1683_v41 = vadd.f32 %v1670_v37, %v1661_v2  ;;  %v1684_v33 = vadd.f32 %v1670_v37, %v1662_v24  ;;  %v1685_v16 = vadd.f32 %v1670_v37, %v1663_v60 }
 0x415   : > { %1692 = vst [vmem:[#allocation10 + $0x20] sm:$0xff] %v1676_v12  ;;  %1693 = vst [vmem:[#allocation10 + $0x28] sm:$0xff] %v1677_v6  ;;  %v1664_v11 = vmul.f32 %v1648_v32, %v3158_v55  ;;  %v1665_v46 = vmul.f32 %v1648_v32, %v3160_v31 }
 0x416   : > { %1694 = vst [vmem:[#allocation10 + $0x30] sm:$0xff] %v1678_v43  ;;  %1695 = vst [vmem:[#allocation10 + $0x38] sm:$0xff] %v1679_v1 }
 0x417   : > { %1696 = vst [vmem:[#allocation10 + $0x40] sm:$0xff] %v1680_v30  ;;  %1697 = vst [vmem:[#allocation10 + $0x48] sm:$0xff] %v1681_v22  ;;  %v1686_v53 = vadd.f32 %v1670_v37, %v1664_v11  ;;  %v1687_v14 = vadd.f32 %v1670_v37, %v1665_v46 }
 0x418   : > { %1698 = vst [vmem:[#allocation10 + $0x50] sm:$0xff] %v1682_v38  ;;  %1699 = vst [vmem:[#allocation10 + $0x58] sm:$0xff] %v1683_v41 }
 0x419   : > { %1700 = vst [vmem:[#allocation10 + $0x60] sm:$0xff] %v1684_v33  ;;  %1701 = vst [vmem:[#allocation10 + $0x68] sm:$0xff] %v1685_v16 }
 0x41a   : > { %1702 = vst [vmem:[#allocation10 + $0x70] sm:$0xff] %v1686_v53  ;;  %1703 = vst [vmem:[#allocation10 + $0x78] sm:$0xff] %v1687_v14 }
 0x41b PF: > { %p2016_p1 = scmp.eq.s32.totalorder %s2497_s9, 1  ;;  %s2365_s11 = smov [#allocation10]  }
 0x41c   : > { %s1712_s16 = sshll.u32 %s2365_s11, 4  ;;  %s1713_s16 = int_to_ptr.vmem [resolvable:$true] %s1712_s16 }
 0x41d   : > { %s2268_s20 = scalar_lea.vmem %s1713_s16, 2048  ;;  %p2275_p6 = scmp.lt.s32.totalorder %s1713_s16, %s1713_s16 }
 0x41e   : > { %p2269_p4 = scmp.ne.s32.totalorder %s1713_s16, %s2268_s20  ;;  %p2276_p3 = scmp.lt.s32.totalorder %s2268_s20, %s2268_s20 }
 0x420   : > { %p2270_p7 = pnand %p2269_p4, %p2016_p1  ;;  %p2277_p9 = por %p2276_p3, %p2275_p6 }
 0x422   : > { %p2271_p13 = pneg %p2270_p7 }
 0x424   : > { %p2278_p2 = pnand %p2277_p9, %p2271_p13 }
 0x426   : > { %2281 = shalt.err (!%p2278_p2)
}
 0x427   : > { %s2282_s23 = scalar_lea.hbm %s3238_s7, 2048 }
 0x428   : > { %p2283_p11 = scmp.ne.s32.totalorder %s3238_s7, %s2282_s23  ;;  %p2288_p8 = scmp.lt.u32.totalorder %s2282_s23, %s3238_s7 }
 0x42a   : > { %p2284_p12 = pnand %p2283_p11, %p2016_p1 }
 0x42c   : > { %p2285_p10 = pneg %p2284_p12 }
 0x42e   : > { %p2290_p0 = pnand %p2288_p8, %p2285_p10 }
 0x430   : > { %2293 = shalt.err (!%p2290_p0)
}
 0x431   : > { %s2366_s1 = smov 128   ;;  %s2367_s13 = smov 8  }
 0x432   : > { %1999 = dma.vmem_to_hbm [thread:$0]  (%p2016_p1), %s1713_s16, 2048, %s3238_s7, [#allocation6], %s2366_s1, %s2366_s1, %s2367_s13  }
 0x433   : > { %2327 = dma.done.wait (%p2016_p1), [#allocation6], 2048  }
 0x434   : > { %2329 = vsyncadd (%p2016_p1), [#allocation6], 4294965248 }
 0x435 PF: > { %s22_s29 = sadd.s32 1, %s2352_s29   ;;  %s3264_s27 = sld [smem:[#allocation14_spill]] }
 0x436   : > { %p19_p5 = scmp.ge.s32.totalorder %s22_s29, 4   ;;  %s3265_s28 = sld [smem:[#allocation15_spill]] }
 0x437   : > { %s3266_s24 = smov %s2336_s25  ;;  %s3267_s25 = smov %s2340_s26 }
 0x438   : > { %s3268_s26 = smov %s2451_s12  ;;  %21 = sbr.rel (!%p19_p5) target bundleno = 8 (0x8), region = 122 }
 0x43f   :  { %1728 = vsyncpa [#allocation5], 1 }
 0x440   :  { %1730 = vsyncpa [#allocation5 + $0x1], 1 }
 0x441   :  { %1731 = vsyncpa [#allocation8], 1 }
 0x442   :  { %1733 = vsyncpa [#allocation8 + $0x1], 1 }
 0x443   :  { %1734 = vsyncpa [#allocation6], 1 }
 0x444   :  { %1736 = vsyncpa [#allocation6 + $0x1], 1 }

</bundles_post_ra>
